<compile_context>
chip_gen: v7x
topology: tpu7x:2x2x1
jax: 0.10.0
libtpu: 0.0.40
codegen_flags: <defaults>
</compile_context>

<pallas_src>
import functools

import jax
import jax.numpy as jnp
from jax.experimental import pallas as pl
from jax.experimental.pallas import tpu as pltpu


NEG_INF = -1e30  # large finite negative: exp() of it underflows to 0, never NaN

# Row indices inside the fused per-layer vector block (L, 8, Ep).
_ROW_BO, _ROW_LN1G, _ROW_LN1B, _ROW_B1, _ROW_B2, _ROW_LN2G, _ROW_LN2B, _ROW_EMASK = range(8)


def _round_up(x, m):
    return (x + m - 1) // m * m


# ----------------------------------------------------------------------------
# Fused Pallas kernel: all transformer blocks + LM head.
# grid = (B // Bblk, num_layers); activation resident in VMEM across layers.
# ----------------------------------------------------------------------------
def fused_transformer_kernel(
    x_ref,        # (Bblk, T, Ep)     f32   embeddings + pos enc (zero padded)
    mask_ref,     # (T, T)            f32   additive causal mask (0 / NEG_INF)
    wqkv_ref,     # (1, Ep, QKVp)     bf16  densely packed Q|K|V projections
    wo_ref,       # (1, H*E, Ep)      bf16  attention fc_out weight (dense K)
    vecs_ref,     # (1, 8, Ep)        f32   fused per-layer vectors (+ lane mask)
    w1_ref,       # (1, Ep, Ep)       bf16  feed_forward[0] weight
    w2_ref,       # (1, Ep, Ep)       bf16  feed_forward[2] weight
    fco_w_ref,    # (Ep, Vp)          bf16  final vocab projection weight
    fco_b_ref,    # (1, Vp)           f32   (padded vocab entries = NEG_INF)
    o_ref,        # (Bblk, 1, Vp)     f32   softmax probabilities (last token)
    acc_ref,      # scratch (Bblk*T, Ep) f32 activation, persists across layers
    *,
    head_count,
    embed_size,
    token_count,
    batch_block,
):
    l = pl.program_id(1)
    num_layers = pl.num_programs(1)
    H = head_count
    E = embed_size
    T = token_count
    Bb = batch_block
    M = Bb * T
    Ep = acc_ref.shape[1]
    inv_E = 1.0 / E

    # Initialize the resident activation from the embeddings at the first layer.
    @pl.when(l == 0)
    def _():
        acc_ref[...] = x_ref[...].reshape(M, Ep)

    x = acc_ref[...]                                   # (M, Ep) f32, pads == 0

    # Fused per-layer vectors (one DMA): biases, layernorm params, lane mask.
    vecs = vecs_ref[0]                                 # (8, Ep)
    bo = vecs[_ROW_BO:_ROW_BO + 1, :]
    ln1_g = vecs[_ROW_LN1G:_ROW_LN1G + 1, :]
    ln1_b = vecs[_ROW_LN1B:_ROW_LN1B + 1, :]
    b1 = vecs[_ROW_B1:_ROW_B1 + 1, :]
    b2 = vecs[_ROW_B2:_ROW_B2 + 1, :]
    ln2_g = vecs[_ROW_LN2G:_ROW_LN2G + 1, :]
    ln2_b = vecs[_ROW_LN2B:_ROW_LN2B + 1, :]
    emask = vecs[_ROW_EMASK:_ROW_EMASK + 1, :]         # (1, Ep), 1.0 on real cols

    mask_bias = mask_ref[...]                          # (T, T) 0 / NEG_INF

    # ---- multi-head self attention (no 1/sqrt(d) scaling: matches reference) ----
    x_b = x.astype(jnp.bfloat16)
    qkv = jnp.dot(x_b, wqkv_ref[0],
                  preferred_element_type=jnp.float32)  # (M, QKVp), one fat matmul
    qkv3 = qkv.reshape(Bb, T, qkv.shape[1]).astype(jnp.bfloat16)

    head_outs = []
    for h in range(H):                                 # tiny static loop (H small)
        q = qkv3[:, :, h * E:(h + 1) * E]              # (Bb, T, E)
        k = qkv3[:, :, (H + h) * E:(H + h + 1) * E]
        v = qkv3[:, :, (2 * H + h) * E:(2 * H + h + 1) * E]

        # Batched over the Bblk sequences in the block (single dot_general).
        energy = jnp.einsum('bqe,bke->bqk', q, k,
                            preferred_element_type=jnp.float32)   # (Bb, T, T)
        energy = energy + mask_bias                               # causal mask

        m = jnp.max(energy, axis=-1, keepdims=True)
        p = jnp.exp(energy - m)
        denom = jnp.sum(p, axis=-1, keepdims=True)
        attn = p * pl.reciprocal(denom, approx=True)   # EUP slot, frees VALU

        head_outs.append(jnp.einsum('bqk,bke->bqe', attn.astype(jnp.bfloat16), v,
                                    preferred_element_type=jnp.float32))

    # H=2 here so concatenate is cheap; for larger H write each head's output
    # directly into a VMEM scratch slice to bound live ranges.
    heads = jnp.concatenate(head_outs, axis=-1).reshape(M, H * E)
    attention = jnp.dot(heads.astype(jnp.bfloat16), wo_ref[0],
                        preferred_element_type=jnp.float32) + bo  # (M, Ep)

    def layernorm(y, g, b):
        # pads of y are exactly 0; mask keeps variance over the real E columns.
        mean = jnp.sum(y, axis=-1, keepdims=True) * inv_E
        cent = (y - mean) * emask
        var = jnp.sum(cent * cent, axis=-1, keepdims=True) * inv_E
        return cent * jax.lax.rsqrt(var + 1e-5) * g + b   # g,b pads = 0 -> out pads 0

    # out = norm1(attention + x)
    h1 = layernorm(attention + x, ln1_g, ln1_b)

    # feed forward: Linear -> ReLU -> Linear
    ff = jnp.dot(h1.astype(jnp.bfloat16), w1_ref[0],
                 preferred_element_type=jnp.float32) + b1
    ff = jnp.maximum(ff, 0.0)
    ff = jnp.dot(ff.astype(jnp.bfloat16), w2_ref[0],
                 preferred_element_type=jnp.float32) + b2

    # out = norm2(attention + feed_forward(out))
    out = layernorm(attention + ff, ln2_g, ln2_b)
    acc_ref[...] = out

    # ---- fused LM head: softmax(fc_out(out[:, -1, :])) on the last layer ----
    @pl.when(l == num_layers - 1)
    def _():
        x_last = out.reshape(Bb, T, Ep)[:, T - 1:T, :].reshape(Bb, Ep)
        logits = jnp.dot(x_last.astype(jnp.bfloat16), fco_w_ref[...],
                         preferred_element_type=jnp.float32) + fco_b_ref[...]
        m = jnp.max(logits, axis=-1, keepdims=True)
        p = jnp.exp(logits - m)                        # padded vocab -> exactly 0
        probs = p / jnp.sum(p, axis=-1, keepdims=True)
        o_ref[...] = probs.reshape(Bb, 1, probs.shape[-1])


# ----------------------------------------------------------------------------
# Wrapper: one pallas_call for the whole forward (blocks + LM head)
# ----------------------------------------------------------------------------
def transformer_forward(input_tokens, packed, *, head_count, embed_size,
                        vocab_size, batch_block=None):
    B, T = input_tokens.shape
    Ep = packed['embedding'].shape[1]
    Vp = packed['fco_b'].shape[1]
    QKVp = packed['wqkv'].shape[2]
    HE = packed['wo'].shape[1]
    L = packed['wqkv'].shape[0]
    H = head_count

    # Collapse the whole batch into one grid step by default (best for the
    # single-TC v5e/v6e).  On v7x pass batch_block = B // 2 so the 2-way
    # "parallel" batch axis keeps both TensorCores busy.
    Bblk = B if batch_block is None else batch_block
    assert B % Bblk == 0
    nb = B // Bblk

    # Plain-JAX glue: embedding gather + sinusoidal position encoding.
    x = packed['embedding'][input_tokens]                              # (B, T, Ep)
    positions = jnp.broadcast_to(jnp.arange(T, dtype=jnp.int32)[None, :], (B, T))
    pe = position_encoding(positions, embed_size)                      # (B, T, E)
    pe = jnp.pad(pe, ((0, 0), (0, 0), (0, Ep - embed_size)))
    x = x + pe

    # Additive causal mask (torch.triu(..., diagonal=1)) built once, host-side.
    row = jnp.arange(T, dtype=jnp.int32)[:, None]
    col = jnp.arange(T, dtype=jnp.int32)[None, :]
    mask_bias = jnp.where(col > row, NEG_INF, 0.0).astype(jnp.float32)  # (T, T)

    kernel = functools.partial(
        fused_transformer_kernel,
        head_count=H, embed_size=embed_size, token_count=T, batch_block=Bblk)

    def layer_spec(shape):
        return pl.BlockSpec((1,) + shape, lambda b, l: (l, 0, 0))

    # TODO(synk): add pipeline_mode=pl.Buffered(3) on the weight specs if the
    #             trace shows exposed weight DMA at layer boundaries.
    probs = pl.pallas_call(
        kernel,
        out_shape=jax.ShapeDtypeStruct((B, 1, Vp), jnp.float32),
        grid=(nb, L),
        in_specs=[
            pl.BlockSpec((Bblk, T, Ep), lambda b, l: (b, 0, 0)),  # x (used at l==0)
            pl.BlockSpec((T, T), lambda b, l: (0, 0)),            # causal mask
            layer_spec((Ep, QKVp)),                               # wqkv (dense)
            layer_spec((HE, Ep)),                                 # wo (dense K)
            layer_spec((8, Ep)),                                  # fused vectors
            layer_spec((Ep, Ep)),                                 # w1
            layer_spec((Ep, Ep)),                                 # w2
            pl.BlockSpec((Ep, Vp), lambda b, l: (0, 0)),          # fc_out w
            pl.BlockSpec((1, Vp), lambda b, l: (0, 0)),           # fc_out b
        ],
        out_specs=pl.BlockSpec((Bblk, 1, Vp), lambda b, l: (b, 0, 0)),
        scratch_shapes=[pltpu.VMEM((Bblk * T, Ep), jnp.float32)],
        compiler_params=pltpu.CompilerParams(
            dimension_semantics=("parallel", "arbitrary")),
    )(
        x, mask_bias,
        packed['wqkv'], packed['wo'], packed['vecs'],
        packed['w1'], packed['w2'],
        packed['fco_w'], packed['fco_b'],
    )
    return probs[:, 0, :vocab_size]                               # (B, V)


# ----------------------------------------------------------------------------
# Plain-JAX glue: sinusoidal position encoding (matches the PyTorch module:
# all sines of even channels first, then cosines of odd channels).
# ----------------------------------------------------------------------------
def position_encoding(positions, embed_size):
    pos = positions[..., None].astype(jnp.float32)                       # (B, T, 1)
    i = jnp.arange(embed_size, dtype=jnp.float32)[None, None, :]         # (1, 1, E)
    angle_rates = 1.0 / jnp.power(10000.0,
                                  2.0 * jnp.floor(i / 2.0) / embed_size)
    angle_rads = pos * angle_rates                                       # (B, T, E)
    sines = jnp.sin(angle_rads[:, :, 0::2])
    cosines = jnp.cos(angle_rads[:, :, 1::2])
    return jnp.concatenate([sines, cosines], axis=-1)                    # (B, T, E)


# ----------------------------------------------------------------------------
# Deterministic parameter init (logical shapes follow the PyTorch __init__),
# then packing into the padded / stacked / bf16 kernel layout.
# ----------------------------------------------------------------------------
def init_params(key, vocab_size, embed_size, num_layers, head_count):
    scale = 0.02

    def nrm(k, shape):
        return scale * jax.random.normal(k, shape, dtype=jnp.float32)

    key, k_emb, k_fcw, k_fcb = jax.random.split(key, 4)
    params = {
        'embedding': nrm(k_emb, (vocab_size, embed_size)),
        # nn.Linear(E, V): weight (V, E) -> stored transposed (E, V)
        'fc_out_w': nrm(k_fcw, (embed_size, vocab_size)),
        'fc_out_b': nrm(k_fcb, (1, vocab_size)),
        'blocks': [],
    }
    for _ in range(num_layers):
        key, kq, kk, kv, kow, kob, kw1, kb1, kw2, kb2 = jax.random.split(key, 10)
        blk = {
            # per-head nn.Linear(E, E, bias=False) weights, stored (in, out)
            'wq': nrm(kq, (head_count, embed_size, embed_size)),
            'wk': nrm(kk, (head_count, embed_size, embed_size)),
            'wv': nrm(kv, (head_count, embed_size, embed_size)),
            # attention fc_out: nn.Linear(H*E, E) -> transposed, split per head
            'wo': nrm(kow, (head_count, embed_size, embed_size)),
            'bo': nrm(kob, (1, embed_size)),
            'ln1_g': jnp.ones((1, embed_size), jnp.float32),
            'ln1_b': jnp.zeros((1, embed_size), jnp.float32),
            'ln2_g': jnp.ones((1, embed_size), jnp.float32),
            'ln2_b': jnp.zeros((1, embed_size), jnp.float32),
            'w1': nrm(kw1, (embed_size, embed_size)),
            'b1': nrm(kb1, (1, embed_size)),
            'w2': nrm(kw2, (embed_size, embed_size)),
            'b2': nrm(kb2, (1, embed_size)),
        }
        params['blocks'].append(blk)
    return params


def pack_params(params, head_count):
    E = params['embedding'].shape[1]
    V = params['fc_out_w'].shape[1]
    Ep = _round_up(E, 128)
    Vp = _round_up(V, 128)
    H = head_count
    QKVp = _round_up(3 * H * E, 128)   # densely packed QKV output columns

    def pad2(w, shape):
        return jnp.zeros(shape, w.dtype).at[:w.shape[0], :w.shape[1]].set(w)

    emb = pad2(params['embedding'], (params['embedding'].shape[0], Ep))
    fco_w = pad2(params['fc_out_w'], (Ep, Vp)).astype(jnp.bfloat16)
    fco_b = jnp.full((1, Vp), NEG_INF, jnp.float32)
    fco_b = fco_b.at[:, :V].set(params['fc_out_b'])

    emask = jnp.zeros((1, Ep), jnp.float32).at[:, :E].set(1.0)

    wqkv_l, wo_l, w1_l, w2_l, vec_l = [], [], [], [], []
    for blk in params['blocks']:
        # Dense QKV packing: q_h at [h*E:(h+1)*E], k_h at [(H+h)*E:...],
        # v_h at [(2H+h)*E:...]; only 3*H*E real columns (+pad to 128).
        wqkv = jnp.zeros((Ep, QKVp), jnp.float32)
        wo = jnp.zeros((H * E, Ep), jnp.float32)        # dense K dim = H*E
        for h in range(H):
            wqkv = wqkv.at[:E, h * E:(h + 1) * E].set(blk['wq'][h])
            wqkv = wqkv.at[:E, (H + h) * E:(H + h + 1) * E].set(blk['wk'][h])
            wqkv = wqkv.at[:E, (2 * H + h) * E:(2 * H + h + 1) * E].set(blk['wv'][h])
            wo = wo.at[h * E:(h + 1) * E, :E].set(blk['wo'][h])
        wqkv_l.append(wqkv.astype(jnp.bfloat16))
        wo_l.append(wo.astype(jnp.bfloat16))
        w1_l.append(pad2(blk['w1'], (Ep, Ep)).astype(jnp.bfloat16))
        w2_l.append(pad2(blk['w2'], (Ep, Ep)).astype(jnp.bfloat16))

        # All small per-layer f32 vectors (+ layernorm lane mask) in ONE block.
        vec = jnp.zeros((8, Ep), jnp.float32)
        vec = vec.at[_ROW_BO:_ROW_BO + 1].set(pad2(blk['bo'], (1, Ep)))
        vec = vec.at[_ROW_LN1G:_ROW_LN1G + 1].set(pad2(blk['ln1_g'], (1, Ep)))
        vec = vec.at[_ROW_LN1B:_ROW_LN1B + 1].set(pad2(blk['ln1_b'], (1, Ep)))
        vec = vec.at[_ROW_B1:_ROW_B1 + 1].set(pad2(blk['b1'], (1, Ep)))
        vec = vec.at[_ROW_B2:_ROW_B2 + 1].set(pad2(blk['b2'], (1, Ep)))
        vec = vec.at[_ROW_LN2G:_ROW_LN2G + 1].set(pad2(blk['ln2_g'], (1, Ep)))
        vec = vec.at[_ROW_LN2B:_ROW_LN2B + 1].set(pad2(blk['ln2_b'], (1, Ep)))
        vec = vec.at[_ROW_EMASK:_ROW_EMASK + 1].set(emask)
        vec_l.append(vec)

    return {
        'embedding': emb,
        'fco_w': fco_w,
        'fco_b': fco_b,
        'wqkv': jnp.stack(wqkv_l, axis=0),
        'wo': jnp.stack(wo_l, axis=0),
        'w1': jnp.stack(w1_l, axis=0),
        'w2': jnp.stack(w2_l, axis=0),
        'vecs': jnp.stack(vec_l, axis=0),
    }


# ----------------------------------------------------------------------------
if __name__ == "__main__":
    vocab_size = 16
    embed_size = 32
    num_layers = 2
    head_count = 2
    batch = 2
    seq = 8

    key = jax.random.PRNGKey(0)
    key, k_tok, k_par = jax.random.split(key, 3)

    input_tokens = jax.random.randint(k_tok, (batch, seq), 0, vocab_size,
                                      dtype=jnp.int32)
    params = init_params(k_par, vocab_size, embed_size, num_layers, head_count)
    packed = pack_params(params, head_count)

    forward = jax.jit(functools.partial(
        transformer_forward,
        head_count=head_count, embed_size=embed_size, vocab_size=vocab_size,
        batch_block=None))  # None -> whole batch in one grid step (v5e/v6e best)

    probs = forward(input_tokens, packed)
    probs = jax.block_until_ready(probs)

    assert probs.shape == (batch, vocab_size)
    assert bool(jnp.all(jnp.isfinite(probs)))
    assert bool(jnp.allclose(jnp.sum(probs, axis=1), 1.0, atol=1e-4))
    print("KERNEL_OK")
</pallas_src>

<mosaic_0001>
module attributes {stable_mosaic.version = 11 : i64} {
  func.func @fused_transformer_kernel(%arg0: i32, %arg1: i32, %arg2: memref<2x8x128xf32, #tpu.memory_space<vmem>>, %arg3: memref<8x8xf32, #tpu.memory_space<vmem>>, %arg4: memref<1x128x256xbf16, #tpu.memory_space<vmem>>, %arg5: memref<1x64x128xbf16, #tpu.memory_space<vmem>>, %arg6: memref<1x8x128xf32, #tpu.memory_space<vmem>>, %arg7: memref<1x128x128xbf16, #tpu.memory_space<vmem>>, %arg8: memref<1x128x128xbf16, #tpu.memory_space<vmem>>, %arg9: memref<128x128xbf16, #tpu.memory_space<vmem>>, %arg10: memref<1x128xf32, #tpu.memory_space<vmem>>, %arg11: memref<2x1x128xf32, #tpu.memory_space<vmem>>, %arg12: memref<16x128xf32, #tpu.memory_space<vmem>>) attributes {dimension_semantics = [#tpu.dimension_semantics<parallel>, #tpu.dimension_semantics<arbitrary>], iteration_bounds = array<i64: 1, 2>, scalar_prefetch = 0 : i64, scratch_operands = 1 : i64, tpu.core_type = #tpu.core_type<tc>, window_params = [{transform_indices = @transform_0, window_bounds = array<i64: 2, 8, 128>}, {pipeline_mode = #tpu.pipeline_mode<synchronous>, transform_indices = @transform_1, window_bounds = array<i64: 8, 8>}, {transform_indices = @transform_2, window_bounds = array<i64: 1, 128, 256>}, {transform_indices = @transform_3, window_bounds = array<i64: 1, 64, 128>}, {transform_indices = @transform_4, window_bounds = array<i64: 1, 8, 128>}, {transform_indices = @transform_5, window_bounds = array<i64: 1, 128, 128>}, {transform_indices = @transform_6, window_bounds = array<i64: 1, 128, 128>}, {pipeline_mode = #tpu.pipeline_mode<synchronous>, transform_indices = @transform_7, window_bounds = array<i64: 128, 128>}, {pipeline_mode = #tpu.pipeline_mode<synchronous>, transform_indices = @transform_8, window_bounds = array<i64: 1, 128>}, {transform_indices = @transform_9, window_bounds = array<i64: 2, 1, 128>}]} {
    %c0_i32 = arith.constant 0 : i32
    %0 = arith.cmpi eq, %arg1, %c0_i32 : i32
    %1 = arith.extui %0 : i1 to i32
    %c0_i32_0 = arith.constant 0 : i32
    %2 = arith.cmpi ne, %1, %c0_i32_0 : i32
    scf.if %2 {
      %c0_44 = arith.constant 0 : index
      %c0_45 = arith.constant 0 : index
      %c0_46 = arith.constant 0 : index
      %131 = vector.load %arg2[%c0_44, %c0_45, %c0_46] : memref<2x8x128xf32, #tpu.memory_space<vmem>>, vector<2x8x128xf32>
      %132 = vector.shape_cast %131 : vector<2x8x128xf32> to vector<16x128xf32>
      %c0_47 = arith.constant 0 : index
      %c0_48 = arith.constant 0 : index
      %133 = vector.load %arg12[%c0_47, %c0_48] : memref<16x128xf32, #tpu.memory_space<vmem>>, vector<16x128xf32>
      tpu.vector_store %arg12[%c0_47, %c0_48], %132 {strides = array<i32>} : memref<16x128xf32, #tpu.memory_space<vmem>>, vector<16x128xf32>,
    } else {
    }
    %c0 = arith.constant 0 : index
    %c0_1 = arith.constant 0 : index
    %3 = vector.load %arg12[%c0, %c0_1] : memref<16x128xf32, #tpu.memory_space<vmem>>, vector<16x128xf32>
    %c0_2 = arith.constant 0 : index
    %c0_3 = arith.constant 0 : index
    %c0_4 = arith.constant 0 : index
    %4 = vector.load %arg6[%c0_2, %c0_3, %c0_4] : memref<1x8x128xf32, #tpu.memory_space<vmem>>, vector<1x8x128xf32>
    %5 = vector.shape_cast %4 : vector<1x8x128xf32> to vector<8x128xf32>
    %6 = vector.extract_strided_slice %5 {offsets = [0, 0], sizes = [1, 128], strides = [1, 1]} : vector<8x128xf32> to vector<1x128xf32>
    %7 = vector.extract_strided_slice %5 {offsets = [1, 0], sizes = [1, 128], strides = [1, 1]} : vector<8x128xf32> to vector<1x128xf32>
    %8 = vector.extract_strided_slice %5 {offsets = [2, 0], sizes = [1, 128], strides = [1, 1]} : vector<8x128xf32> to vector<1x128xf32>
    %9 = vector.extract_strided_slice %5 {offsets = [3, 0], sizes = [1, 128], strides = [1, 1]} : vector<8x128xf32> to vector<1x128xf32>
    %10 = vector.extract_strided_slice %5 {offsets = [4, 0], sizes = [1, 128], strides = [1, 1]} : vector<8x128xf32> to vector<1x128xf32>
    %11 = vector.extract_strided_slice %5 {offsets = [5, 0], sizes = [1, 128], strides = [1, 1]} : vector<8x128xf32> to vector<1x128xf32>
    %12 = vector.extract_strided_slice %5 {offsets = [6, 0], sizes = [1, 128], strides = [1, 1]} : vector<8x128xf32> to vector<1x128xf32>
    %13 = vector.extract_strided_slice %5 {offsets = [7, 0], sizes = [1, 128], strides = [1, 1]} : vector<8x128xf32> to vector<1x128xf32>
    %c0_5 = arith.constant 0 : index
    %c0_6 = arith.constant 0 : index
    %14 = vector.load %arg3[%c0_5, %c0_6] : memref<8x8xf32, #tpu.memory_space<vmem>>, vector<8x8xf32>
    %15 = arith.truncf %3 : vector<16x128xf32> to vector<16x128xbf16>
    %c0_7 = arith.constant 0 : index
    %c0_8 = arith.constant 0 : index
    %c0_9 = arith.constant 0 : index
    %16 = vector.load %arg4[%c0_7, %c0_8, %c0_9] : memref<1x128x256xbf16, #tpu.memory_space<vmem>>, vector<1x128x256xbf16>
    %17 = vector.shape_cast %16 : vector<1x128x256xbf16> to vector<128x256xbf16>
    %cst = arith.constant dense<0.000000e+00> : vector<16x256xf32>
    %18 = tpu.matmul %15, %17, %cst {dimension_numbers = #tpu.dot_dimension_numbers<[1], [0], [0], [1], [0, 0, 1, 1], [], []>} : vector<16x128xbf16>, vector<128x256xbf16>, vector<16x256xf32> -> vector<16x256xf32>
    %19 = vector.shape_cast %18 : vector<16x256xf32> to vector<2x8x256xf32>
    %20 = arith.truncf %19 : vector<2x8x256xf32> to vector<2x8x256xbf16>
    %21 = vector.extract_strided_slice %20 {offsets = [0, 0, 0], sizes = [2, 8, 32], strides = [1, 1, 1]} : vector<2x8x256xbf16> to vector<2x8x32xbf16>
    %22 = vector.extract_strided_slice %20 {offsets = [0, 0, 64], sizes = [2, 8, 32], strides = [1, 1, 1]} : vector<2x8x256xbf16> to vector<2x8x32xbf16>
    %23 = vector.extract_strided_slice %20 {offsets = [0, 0, 128], sizes = [2, 8, 32], strides = [1, 1, 1]} : vector<2x8x256xbf16> to vector<2x8x32xbf16>
    "tpu.trace_start"() <{level = 10 : i32, message = "bqe,bke->bqk"}> : () -> ()
    %cst_10 = arith.constant dense<0.000000e+00> : vector<2x8x8xf32>
    %24 = tpu.matmul %21, %22, %cst_10 {dimension_numbers = #tpu.dot_dimension_numbers<[2], [2], [1], [1], [0, 0, 0, 1, 1, 1], [0], [0]>} : vector<2x8x32xbf16>, vector<2x8x32xbf16>, vector<2x8x8xf32> -> vector<2x8x8xf32>
    "tpu.trace_stop"() : () -> ()
    %25 = vector.shape_cast %14 : vector<8x8xf32> to vector<1x8x8xf32>
    %26 = vector.broadcast %25 : vector<1x8x8xf32> to vector<2x8x8xf32>
    %27 = arith.addf %24, %26 : vector<2x8x8xf32>
    %cst_11 = arith.constant dense<0xFF800000> : vector<2x8xf32>
    %28 = vector.multi_reduction <maximumf>, %27, %cst_11 [2] : vector<2x8x8xf32> to vector<2x8xf32>
    %29 = vector.shape_cast %28 : vector<2x8xf32> to vector<2x8x1xf32>
    %30 = vector.broadcast %29 : vector<2x8x1xf32> to vector<2x8x8xf32>
    %31 = arith.subf %27, %30 : vector<2x8x8xf32>
    %32 = math.exp %31 : vector<2x8x8xf32>
    %cst_12 = arith.constant dense<0.000000e+00> : vector<2x8xf32>
    %33 = vector.multi_reduction <add>, %32, %cst_12 [2] : vector<2x8x8xf32> to vector<2x8xf32>
    %34 = vector.shape_cast %33 : vector<2x8xf32> to vector<2x8x1xf32>
    %35 = tpu.reciprocal %34 {approx = true} : vector<2x8x1xf32> -> vector<2x8x1xf32>
    %36 = vector.broadcast %35 : vector<2x8x1xf32> to vector<2x8x8xf32>
    %37 = arith.mulf %32, %36 : vector<2x8x8xf32>
    %38 = arith.truncf %37 : vector<2x8x8xf32> to vector<2x8x8xbf16>
    "tpu.trace_start"() <{level = 10 : i32, message = "bqk,bke->bqe"}> : () -> ()
    %cst_13 = arith.constant dense<0.000000e+00> : vector<2x8x32xf32>
    %39 = tpu.matmul %38, %23, %cst_13 {dimension_numbers = #tpu.dot_dimension_numbers<[2], [1], [1], [2], [0, 0, 0, 1, 1, 2], [0], [0]>} : vector<2x8x8xbf16>, vector<2x8x32xbf16>, vector<2x8x32xf32> -> vector<2x8x32xf32>
    "tpu.trace_stop"() : () -> ()
    %40 = vector.extract_strided_slice %20 {offsets = [0, 0, 32], sizes = [2, 8, 32], strides = [1, 1, 1]} : vector<2x8x256xbf16> to vector<2x8x32xbf16>
    %41 = vector.extract_strided_slice %20 {offsets = [0, 0, 96], sizes = [2, 8, 32], strides = [1, 1, 1]} : vector<2x8x256xbf16> to vector<2x8x32xbf16>
    %42 = vector.extract_strided_slice %20 {offsets = [0, 0, 160], sizes = [2, 8, 32], strides = [1, 1, 1]} : vector<2x8x256xbf16> to vector<2x8x32xbf16>
    "tpu.trace_start"() <{level = 10 : i32, message = "bqe,bke->bqk"}> : () -> ()
    %cst_14 = arith.constant dense<0.000000e+00> : vector<2x8x8xf32>
    %43 = tpu.matmul %40, %41, %cst_14 {dimension_numbers = #tpu.dot_dimension_numbers<[2], [2], [1], [1], [0, 0, 0, 1, 1, 1], [0], [0]>} : vector<2x8x32xbf16>, vector<2x8x32xbf16>, vector<2x8x8xf32> -> vector<2x8x8xf32>
    "tpu.trace_stop"() : () -> ()
    %44 = vector.shape_cast %14 : vector<8x8xf32> to vector<1x8x8xf32>
    %45 = vector.broadcast %44 : vector<1x8x8xf32> to vector<2x8x8xf32>
    %46 = arith.addf %43, %45 : vector<2x8x8xf32>
    %cst_15 = arith.constant dense<0xFF800000> : vector<2x8xf32>
    %47 = vector.multi_reduction <maximumf>, %46, %cst_15 [2] : vector<2x8x8xf32> to vector<2x8xf32>
    %48 = vector.shape_cast %47 : vector<2x8xf32> to vector<2x8x1xf32>
    %49 = vector.broadcast %48 : vector<2x8x1xf32> to vector<2x8x8xf32>
    %50 = arith.subf %46, %49 : vector<2x8x8xf32>
    %51 = math.exp %50 : vector<2x8x8xf32>
    %cst_16 = arith.constant dense<0.000000e+00> : vector<2x8xf32>
    %52 = vector.multi_reduction <add>, %51, %cst_16 [2] : vector<2x8x8xf32> to vector<2x8xf32>
    %53 = vector.shape_cast %52 : vector<2x8xf32> to vector<2x8x1xf32>
    %54 = tpu.reciprocal %53 {approx = true} : vector<2x8x1xf32> -> vector<2x8x1xf32>
    %55 = vector.broadcast %54 : vector<2x8x1xf32> to vector<2x8x8xf32>
    %56 = arith.mulf %51, %55 : vector<2x8x8xf32>
    %57 = arith.truncf %56 : vector<2x8x8xf32> to vector<2x8x8xbf16>
    "tpu.trace_start"() <{level = 10 : i32, message = "bqk,bke->bqe"}> : () -> ()
    %cst_17 = arith.constant dense<0.000000e+00> : vector<2x8x32xf32>
    %58 = tpu.matmul %57, %42, %cst_17 {dimension_numbers = #tpu.dot_dimension_numbers<[2], [1], [1], [2], [0, 0, 0, 1, 1, 2], [0], [0]>} : vector<2x8x8xbf16>, vector<2x8x32xbf16>, vector<2x8x32xf32> -> vector<2x8x32xf32>
    "tpu.trace_stop"() : () -> ()
    %59 = tpu.concatenate %39, %58 in 2 : vector<2x8x32xf32>, vector<2x8x32xf32> -> vector<2x8x64xf32>
    %60 = vector.shape_cast %59 : vector<2x8x64xf32> to vector<16x64xf32>
    %61 = arith.truncf %60 : vector<16x64xf32> to vector<16x64xbf16>
    %c0_18 = arith.constant 0 : index
    %c0_19 = arith.constant 0 : index
    %c0_20 = arith.constant 0 : index
    %62 = vector.load %arg5[%c0_18, %c0_19, %c0_20] : memref<1x64x128xbf16, #tpu.memory_space<vmem>>, vector<1x64x128xbf16>
    %63 = vector.shape_cast %62 : vector<1x64x128xbf16> to vector<64x128xbf16>
    %cst_21 = arith.constant dense<0.000000e+00> : vector<16x128xf32>
    %64 = tpu.matmul %61, %63, %cst_21 {dimension_numbers = #tpu.dot_dimension_numbers<[1], [0], [0], [1], [0, 0, 1, 1], [], []>} : vector<16x64xbf16>, vector<64x128xbf16>, vector<16x128xf32> -> vector<16x128xf32>
    %65 = vector.broadcast %6 : vector<1x128xf32> to vector<16x128xf32>
    %66 = arith.addf %64, %65 : vector<16x128xf32>
    %67 = arith.addf %66, %3 : vector<16x128xf32>
    %cst_22 = arith.constant dense<0.000000e+00> : vector<16xf32>
    %68 = vector.multi_reduction <add>, %67, %cst_22 [1] : vector<16x128xf32> to vector<16xf32>
    %69 = vector.shape_cast %68 : vector<16xf32> to vector<16x1xf32>
    %cst_23 = arith.constant 3.125000e-02 : f32
    %70 = vector.broadcast %cst_23 : f32 to vector<16x1xf32>
    %71 = arith.mulf %69, %70 : vector<16x1xf32>
    %72 = vector.broadcast %71 : vector<16x1xf32> to vector<16x128xf32>
    %73 = arith.subf %67, %72 : vector<16x128xf32>
    %74 = vector.broadcast %13 : vector<1x128xf32> to vector<16x128xf32>
    %75 = arith.mulf %73, %74 : vector<16x128xf32>
    %76 = arith.mulf %75, %75 : vector<16x128xf32>
    %cst_24 = arith.constant dense<0.000000e+00> : vector<16xf32>
    %77 = vector.multi_reduction <add>, %76, %cst_24 [1] : vector<16x128xf32> to vector<16xf32>
    %78 = vector.shape_cast %77 : vector<16xf32> to vector<16x1xf32>
    %cst_25 = arith.constant 3.125000e-02 : f32
    %79 = vector.broadcast %cst_25 : f32 to vector<16x1xf32>
    %80 = arith.mulf %78, %79 : vector<16x1xf32>
    %cst_26 = arith.constant 9.99999974E-6 : f32
    %81 = vector.broadcast %cst_26 : f32 to vector<16x1xf32>
    %82 = arith.addf %80, %81 : vector<16x1xf32>
    %83 = math.rsqrt %82 : vector<16x1xf32>
    %84 = vector.broadcast %83 : vector<16x1xf32> to vector<16x128xf32>
    %85 = arith.mulf %75, %84 : vector<16x128xf32>
    %86 = vector.broadcast %7 : vector<1x128xf32> to vector<16x128xf32>
    %87 = arith.mulf %85, %86 : vector<16x128xf32>
    %88 = vector.broadcast %8 : vector<1x128xf32> to vector<16x128xf32>
    %89 = arith.addf %87, %88 : vector<16x128xf32>
    %90 = arith.truncf %89 : vector<16x128xf32> to vector<16x128xbf16>
    %c0_27 = arith.constant 0 : index
    %c0_28 = arith.constant 0 : index
    %c0_29 = arith.constant 0 : index
    %91 = vector.load %arg7[%c0_27, %c0_28, %c0_29] : memref<1x128x128xbf16, #tpu.memory_space<vmem>>, vector<1x128x128xbf16>
    %92 = vector.shape_cast %91 : vector<1x128x128xbf16> to vector<128x128xbf16>
    %cst_30 = arith.constant dense<0.000000e+00> : vector<16x128xf32>
    %93 = tpu.matmul %90, %92, %cst_30 {dimension_numbers = #tpu.dot_dimension_numbers<[1], [0], [0], [1], [0, 0, 1, 1], [], []>} : vector<16x128xbf16>, vector<128x128xbf16>, vector<16x128xf32> -> vector<16x128xf32>
    %94 = vector.broadcast %9 : vector<1x128xf32> to vector<16x128xf32>
    %95 = arith.addf %93, %94 : vector<16x128xf32>
    %cst_31 = arith.constant 0.000000e+00 : f32
    %96 = vector.broadcast %cst_31 : f32 to vector<16x128xf32>
    %97 = arith.maximumf %95, %96 : vector<16x128xf32>
    %98 = arith.truncf %97 : vector<16x128xf32> to vector<16x128xbf16>
    %c0_32 = arith.constant 0 : index
    %c0_33 = arith.constant 0 : index
    %c0_34 = arith.constant 0 : index
    %99 = vector.load %arg8[%c0_32, %c0_33, %c0_34] : memref<1x128x128xbf16, #tpu.memory_space<vmem>>, vector<1x128x128xbf16>
    %100 = vector.shape_cast %99 : vector<1x128x128xbf16> to vector<128x128xbf16>
    %cst_35 = arith.constant dense<0.000000e+00> : vector<16x128xf32>
    %101 = tpu.matmul %98, %100, %cst_35 {dimension_numbers = #tpu.dot_dimension_numbers<[1], [0], [0], [1], [0, 0, 1, 1], [], []>} : vector<16x128xbf16>, vector<128x128xbf16>, vector<16x128xf32> -> vector<16x128xf32>
    %102 = vector.broadcast %10 : vector<1x128xf32> to vector<16x128xf32>
    %103 = arith.addf %101, %102 : vector<16x128xf32>
    %104 = arith.addf %66, %103 : vector<16x128xf32>
    %cst_36 = arith.constant dense<0.000000e+00> : vector<16xf32>
    %105 = vector.multi_reduction <add>, %104, %cst_36 [1] : vector<16x128xf32> to vector<16xf32>
    %106 = vector.shape_cast %105 : vector<16xf32> to vector<16x1xf32>
    %cst_37 = arith.constant 3.125000e-02 : f32
    %107 = vector.broadcast %cst_37 : f32 to vector<16x1xf32>
    %108 = arith.mulf %106, %107 : vector<16x1xf32>
    %109 = vector.broadcast %108 : vector<16x1xf32> to vector<16x128xf32>
    %110 = arith.subf %104, %109 : vector<16x128xf32>
    %111 = vector.broadcast %13 : vector<1x128xf32> to vector<16x128xf32>
    %112 = arith.mulf %110, %111 : vector<16x128xf32>
    %113 = arith.mulf %112, %112 : vector<16x128xf32>
    %cst_38 = arith.constant dense<0.000000e+00> : vector<16xf32>
    %114 = vector.multi_reduction <add>, %113, %cst_38 [1] : vector<16x128xf32> to vector<16xf32>
    %115 = vector.shape_cast %114 : vector<16xf32> to vector<16x1xf32>
    %cst_39 = arith.constant 3.125000e-02 : f32
    %116 = vector.broadcast %cst_39 : f32 to vector<16x1xf32>
    %117 = arith.mulf %115, %116 : vector<16x1xf32>
    %cst_40 = arith.constant 9.99999974E-6 : f32
    %118 = vector.broadcast %cst_40 : f32 to vector<16x1xf32>
    %119 = arith.addf %117, %118 : vector<16x1xf32>
    %120 = math.rsqrt %119 : vector<16x1xf32>
    %121 = vector.broadcast %120 : vector<16x1xf32> to vector<16x128xf32>
    %122 = arith.mulf %112, %121 : vector<16x128xf32>
    %123 = vector.broadcast %11 : vector<1x128xf32> to vector<16x128xf32>
    %124 = arith.mulf %122, %123 : vector<16x128xf32>
    %125 = vector.broadcast %12 : vector<1x128xf32> to vector<16x128xf32>
    %126 = arith.addf %124, %125 : vector<16x128xf32>
    %c0_41 = arith.constant 0 : index
    %c0_42 = arith.constant 0 : index
    %127 = vector.load %arg12[%c0_41, %c0_42] : memref<16x128xf32, #tpu.memory_space<vmem>>, vector<16x128xf32>
    tpu.vector_store %arg12[%c0_41, %c0_42], %126 {strides = array<i32>} : memref<16x128xf32, #tpu.memory_space<vmem>>, vector<16x128xf32>,
    %c1_i32 = arith.constant 1 : i32
    %128 = arith.cmpi eq, %arg1, %c1_i32 : i32
    %129 = arith.extui %128 : i1 to i32
    %c0_i32_43 = arith.constant 0 : i32
    %130 = arith.cmpi ne, %129, %c0_i32_43 : i32
    scf.if %130 {
      %131 = vector.shape_cast %126 : vector<16x128xf32> to vector<2x8x128xf32>
      %132 = vector.extract_strided_slice %131 {offsets = [0, 7, 0], sizes = [2, 1, 128], strides = [1, 1, 1]} : vector<2x8x128xf32> to vector<2x1x128xf32>
      %133 = vector.shape_cast %132 : vector<2x1x128xf32> to vector<2x128xf32>
      %134 = arith.truncf %133 : vector<2x128xf32> to vector<2x128xbf16>
      %c0_44 = arith.constant 0 : index
      %c0_45 = arith.constant 0 : index
      %135 = vector.load %arg9[%c0_44, %c0_45] : memref<128x128xbf16, #tpu.memory_space<vmem>>, vector<128x128xbf16>
      %cst_46 = arith.constant dense<0.000000e+00> : vector<2x128xf32>
      %136 = tpu.matmul %134, %135, %cst_46 {dimension_numbers = #tpu.dot_dimension_numbers<[1], [0], [0], [1], [0, 0, 1, 1], [], []>} : vector<2x128xbf16>, vector<128x128xbf16>, vector<2x128xf32> -> vector<2x128xf32>
      %c0_47 = arith.constant 0 : index
      %c0_48 = arith.constant 0 : index
      %137 = vector.load %arg10[%c0_47, %c0_48] : memref<1x128xf32, #tpu.memory_space<vmem>>, vector<1x128xf32>
      %138 = vector.broadcast %137 : vector<1x128xf32> to vector<2x128xf32>
      %139 = arith.addf %136, %138 : vector<2x128xf32>
      %cst_49 = arith.constant dense<0xFF800000> : vector<2xf32>
      %140 = vector.multi_reduction <maximumf>, %139, %cst_49 [1] : vector<2x128xf32> to vector<2xf32>
      %141 = vector.shape_cast %140 : vector<2xf32> to vector<2x1xf32>
      %142 = vector.broadcast %141 : vector<2x1xf32> to vector<2x128xf32>
      %143 = arith.subf %139, %142 : vector<2x128xf32>
      %144 = math.exp %143 : vector<2x128xf32>
      %cst_50 = arith.constant dense<0.000000e+00> : vector<2xf32>
      %145 = vector.multi_reduction <add>, %144, %cst_50 [1] : vector<2x128xf32> to vector<2xf32>
      %146 = vector.shape_cast %145 : vector<2xf32> to vector<2x1xf32>
      %147 = vector.broadcast %146 : vector<2x1xf32> to vector<2x128xf32>
      %148 = arith.divf %144, %147 : vector<2x128xf32>
      %149 = vector.shape_cast %148 : vector<2x128xf32> to vector<2x1x128xf32>
      %c0_51 = arith.constant 0 : index
      %c0_52 = arith.constant 0 : index
      %c0_53 = arith.constant 0 : index
      %150 = vector.load %arg11[%c0_51, %c0_52, %c0_53] : memref<2x1x128xf32, #tpu.memory_space<vmem>>, vector<2x1x128xf32>
      tpu.vector_store %arg11[%c0_51, %c0_52, %c0_53], %149 {strides = array<i32>} : memref<2x1x128xf32, #tpu.memory_space<vmem>>, vector<2x1x128xf32>,
    } else {
    }
    return
  }
  func.func @transform_0(%arg0: i32, %arg1: i32) -> (i32, i32, i32) {
    %c0_i32 = arith.constant 0 : i32
    %c0_i32_0 = arith.constant 0 : i32
    %c0_i32_1 = arith.constant 0 : i32
    return %arg0, %c0_i32, %c0_i32_0 : i32, i32, i32
  }
  func.func @transform_1(%arg0: i32, %arg1: i32) -> (i32, i32) {
    %c0_i32 = arith.constant 0 : i32
    %c0_i32_0 = arith.constant 0 : i32
    %c0_i32_1 = arith.constant 0 : i32
    return %c0_i32, %c0_i32_0 : i32, i32
  }
  func.func @transform_2(%arg0: i32, %arg1: i32) -> (i32, i32, i32) {
    %c0_i32 = arith.constant 0 : i32
    %c0_i32_0 = arith.constant 0 : i32
    %c0_i32_1 = arith.constant 0 : i32
    return %arg1, %c0_i32, %c0_i32_0 : i32, i32, i32
  }
  func.func @transform_3(%arg0: i32, %arg1: i32) -> (i32, i32, i32) {
    %c0_i32 = arith.constant 0 : i32
    %c0_i32_0 = arith.constant 0 : i32
    %c0_i32_1 = arith.constant 0 : i32
    return %arg1, %c0_i32, %c0_i32_0 : i32, i32, i32
  }
  func.func @transform_4(%arg0: i32, %arg1: i32) -> (i32, i32, i32) {
    %c0_i32 = arith.constant 0 : i32
    %c0_i32_0 = arith.constant 0 : i32
    %c0_i32_1 = arith.constant 0 : i32
    return %arg1, %c0_i32, %c0_i32_0 : i32, i32, i32
  }
  func.func @transform_5(%arg0: i32, %arg1: i32) -> (i32, i32, i32) {
    %c0_i32 = arith.constant 0 : i32
    %c0_i32_0 = arith.constant 0 : i32
    %c0_i32_1 = arith.constant 0 : i32
    return %arg1, %c0_i32, %c0_i32_0 : i32, i32, i32
  }
  func.func @transform_6(%arg0: i32, %arg1: i32) -> (i32, i32, i32) {
    %c0_i32 = arith.constant 0 : i32
    %c0_i32_0 = arith.constant 0 : i32
    %c0_i32_1 = arith.constant 0 : i32
    return %arg1, %c0_i32, %c0_i32_0 : i32, i32, i32
  }
  func.func @transform_7(%arg0: i32, %arg1: i32) -> (i32, i32) {
    %c0_i32 = arith.constant 0 : i32
    %c0_i32_0 = arith.constant 0 : i32
    %c0_i32_1 = arith.constant 0 : i32
    return %c0_i32, %c0_i32_0 : i32, i32
  }
  func.func @transform_8(%arg0: i32, %arg1: i32) -> (i32, i32) {
    %c0_i32 = arith.constant 0 : i32
    %c0_i32_0 = arith.constant 0 : i32
    %c0_i32_1 = arith.constant 0 : i32
    return %c0_i32, %c0_i32_0 : i32, i32
  }
  func.func @transform_9(%arg0: i32, %arg1: i32) -> (i32, i32, i32) {
    %c0_i32 = arith.constant 0 : i32
    %c0_i32_0 = arith.constant 0 : i32
    %c0_i32_1 = arith.constant 0 : i32
    return %arg0, %c0_i32, %c0_i32_0 : i32, i32, i32
  }
}

</mosaic_0001>

<bundles_post_ra>
// kernel: sin.1
= control target key start
LH: loop header
LB: loop body
LE: loop exit
PB: predicated region body
PF: predicated region fallthrough
CT: control target
= control target key end

     0   :  { %v248_v24 = vmov 683565275   ;;  %v249_v26 = vmov 2475754826   ;;  %v250_v28 = vmov 2131351028   ;;  %s346_s0 = inlined_call_operand.vmem [shape: f32[2,8,16], index: 0, kind: input, shape index: {}]   ;;  %s347_s1 = inlined_call_operand.vmem [shape: f32[2,8,16], index: 1, kind: output, shape index: {}]  }
   0x1   :  { %v267_v0 = vld [vmem:[%s346_s0] sm:$0xff]  ;;  %v272_v1 = vld [vmem:[%s346_s0 + $0x8] sm:$0xff]  ;;  %v251_v30 = vmov 2102212464   ;;  %v252_v32 = vmov 920167782  }
   0x2   :  { %v3_v2 = vand.u32 2147483647, %v267_v0  ;;  %v6_v3 = vand.u32 2139095040, %v267_v0  ;;  %v110_v4 = vand.u32 2147483647, %v272_v1  ;;  %v113_v5 = vand.u32 2139095040, %v272_v1 }
   0x3   :  { %v253_v40 = vmov 1326507024   ;;  %vm5_vm14 = vcmp.lt.s32.totalorder %v267_v0, 0 }
   0x4   :  { %v7_v6 = vshrl.u32 %v6_v3, 23  ;;  %v10_v7 = vand.u32 8388607, %v3_v2  ;;  %v114_v8 = vshrl.u32 %v113_v5, 23  ;;  %v117_v9 = vand.u32 8388607, %v110_v4 }
   0x5   :  { %vm4_vm15 = vcmp.le.f32.partialorder %v3_v2, 0.7853982 }
   0x6   :  { %v216_v10 = vadd.s32 4294967169, %v7_v6  ;;  %v221_v11 = vadd.s32 4294967169, %v114_v8  ;;  %v11_v13 = vor.u32 8388608, %v10_v7  ;;  %v118_v14 = vor.u32 8388608, %v117_v9 }
   0x8   :  { %v13_v12 = vadd.s32 1, %v216_v10  ;;  %v120_v15 = vadd.s32 1, %v221_v11  ;;  %v282_v20 = vshll.u32 %v11_v13, 8  ;;  %v284_v22 = vshll.u32 %v118_v14, 8 }
   0xa   :  { %vm14_vm0 = vcmp.gt.s32.totalorder %v13_v12, 0  ;;  %vm121_vm1 = vcmp.gt.s32.totalorder %v120_v15, 0 }
   0xb   :  { %v15_v16 = vsel %vm14_vm0, %v13_v12, 0  ;;  %v122_v19 = vsel %vm121_vm1, %v120_v15, 0  ;;  %vm112_vm0 = vcmp.lt.s32.totalorder %v272_v1, 0  ;;  %vm111_vm1 = vcmp.le.f32.partialorder %v110_v4, 0.7853982 }
   0xc   :  { %v16_v17 = vshrl.u32 %v15_v16, 5  ;;  %v17_v18 = vand.u32 31, %v15_v16  ;;  %v124_v21 = vand.u32 31, %v122_v19  ;;  %v286_v34 = vshrl.u32 %v122_v19, 5 }
   0xe   :  { %v18_v23 = vsub.s32 32, %v17_v18  ;;  %v20_v25 = vshll.u32 %v248_v24, %v17_v18  ;;  %v23_v27 = vshll.u32 %v249_v26, %v17_v18  ;;  %v26_v29 = vshll.u32 %v250_v28, %v17_v18 }
   0xf   :  { %v29_v31 = vshll.u32 %v251_v30, %v17_v18  ;;  %v32_v33 = vshll.u32 %v252_v32, %v17_v18  ;;  %vm35_vm2 = vcmp.lt.s32.totalorder %v16_v17, 1  ;;  %vm36_vm3 = vcmp.lt.s32.totalorder %v16_v17, 2 }
  0x10   :  { %v19_v35 = vshrl.u32 %v248_v24, %v18_v23  ;;  %v21_v36 = vshrl.u32 %v249_v26, %v18_v23  ;;  %v24_v37 = vshrl.u32 %v250_v28, %v18_v23  ;;  %v27_v38 = vshrl.u32 %v251_v30, %v18_v23 }
  0x11   :  { %v30_v39 = vshrl.u32 %v252_v32, %v18_v23  ;;  %v33_v41 = vshrl.u32 %v253_v40, %v18_v23  ;;  %vm38_vm4 = vcmp.lt.s32.totalorder %v16_v17, 4  ;;  %v125_v45 = vsub.s32 32, %v124_v21 }
  0x12   :  { %v22_v42 = vor.u32 %v21_v36, %v20_v25  ;;  %v25_v43 = vor.u32 %v24_v37, %v23_v27  ;;  %v28_v44 = vor.u32 %v27_v38, %v26_v29  ;;  %vm37_vm5 = vcmp.lt.s32.totalorder %v16_v17, 3 }
  0x13   :  { %v31_v46 = vor.u32 %v30_v39, %v29_v31  ;;  %v34_v47 = vor.u32 %v33_v41, %v32_v33  ;;  %v127_v48 = vshll.u32 %v248_v24, %v124_v21  ;;  %v130_v56 = vshll.u32 %v249_v26, %v124_v21 }
  0x14   :  { %v39_v49 = vsel %vm35_vm2, %v19_v35, %v22_v42  ;;  %v40_v50 = vsel %vm38_vm4, %v28_v44, 2102212464  ;;  %v43_v51 = vsel %vm35_vm2, %v22_v42, %v25_v43  ;;  %v47_v52 = vsel %vm35_vm2, %v25_v43, %v28_v44 }
  0x15   :  { %v41_v53 = vsel %vm37_vm5, %v25_v43, %v40_v50  ;;  %v44_v54 = vsel %vm38_vm4, %v31_v46, 920167782  ;;  %v48_v55 = vsel %vm38_vm4, %v34_v47, 1326507024  ;;  %v126_v59 = vshrl.u32 %v248_v24, %v125_v45 }
  0x16   :  { %v45_v57 = vsel %vm37_vm5, %v28_v44, %v44_v54  ;;  %v49_v58 = vsel %vm37_vm5, %v31_v46, %v48_v55  ;;  %v128_v60 = vshrl.u32 %v249_v26, %v125_v45  ;;  %v42_v61 = vsel %vm36_vm3, %v39_v49, %v41_v53 }
  0x17   :  { %v46_v62 = vsel %vm36_vm3, %v43_v51, %v45_v57  ;;  %v50_v63 = vsel %vm36_vm3, %v47_v52, %v49_v58  ;;  %v131_v3 = vshrl.u32 %v250_v28, %v125_v45  ;;  %v133_v11 = vshll.u32 %v250_v28, %v124_v21 }
  0x18   :  { %v295_v5 = vmul.u32.u64.low %v282_v20, %v50_v63  ;;  %v296_v6 = vmul.u32.u64.high %v282_v20, %v50_v63, %v295_v5  ;;  %v299_v7 = vmul.u32.u64.low %v282_v20, %v46_v62  ;;  %v300_v8 = vmul.u32.u64.high %v282_v20, %v46_v62, %v299_v7 }
  0x19   :  { %v129_v9 = vor.u32 %v128_v60, %v127_v48  ;;  %v132_v10 = vor.u32 %v131_v3, %v130_v56  ;;  %v134_v12 = vshrl.u32 %v251_v30, %v125_v45  ;;  %v136_v13 = vshll.u32 %v251_v30, %v124_v21 }
  0x1a   :  { %v137_v14 = vshrl.u32 %v252_v32, %v125_v45  ;;  %v139_v15 = vshll.u32 %v252_v32, %v124_v21  ;;  %v140_v16 = vshrl.u32 %v253_v40, %v125_v45  ;;  %v58_v17 = vmul.u32 %v282_v20, %v42_v61 }
  0x1b   :  { %v135_v18 = vor.u32 %v134_v12, %v133_v11  ;;  %vm142_vm6 = vcmp.lt.s32.totalorder %v286_v34, 1  ;;  %vm143_vm7 = vcmp.lt.s32.totalorder %v286_v34, 2  ;;  %vm60_vm8 = vc.u32 %v296_v6, %v299_v7 }
  0x1c   :  { %v61_v19 = vadd.s32 1, %v300_v8  ;;  %v138_v20 = vor.u32 %v137_v14, %v136_v13  ;;  %vm144_vm9 = vcmp.lt.s32.totalorder %v286_v34, 3  ;;  %v141_v21 = vor.u32 %v140_v16, %v139_v15 }
  0x1d   :  { %vm145_vm10 = vcmp.lt.s32.totalorder %v286_v34, 4  ;;  %v146_v23 = vsel %vm142_vm6, %v126_v59, %v129_v9  ;;  %v150_v24 = vsel %vm142_vm6, %v129_v9, %v132_v10  ;;  %v154_v28 = vsel %vm142_vm6, %v132_v10, %v135_v18 }
  0x1e   :  { %v62_v25 = vsel %vm60_vm8, %v61_v19, %v300_v8  ;;  %v147_v26 = vsel %vm145_vm10, %v135_v18, 2102212464  ;;  %v151_v27 = vsel %vm145_vm10, %v138_v20, 920167782  ;;  %v155_v32 = vsel %vm145_vm10, %v141_v21, 1326507024 }
  0x1f   :  { %v63_v29 = vadd.s32 %v62_v25, %v58_v17  ;;  %v148_v30 = vsel %vm144_vm9, %v132_v10, %v147_v26  ;;  %v152_v31 = vsel %vm144_vm9, %v135_v18, %v151_v27  ;;  %v156_v36 = vsel %vm144_vm9, %v138_v20, %v155_v32 }
  0x20   :  { %v149_v33 = vsel %vm143_vm7, %v146_v23, %v148_v30  ;;  %v153_v35 = vsel %vm143_vm7, %v150_v24, %v152_v31  ;;  %v157_v34 = vsel %vm143_vm7, %v154_v28, %v156_v36  ;;  %v59_v56 = vadd.s32 %v299_v7, %v296_v6 }
  0x21   :  { %v64_v37 = vadd.s32 536870912, %v63_v29  ;;  %v317_v38 = vmul.u32.u64.low %v284_v22, %v153_v35  ;;  %v318_v39 = vmul.u32.u64.high %v284_v22, %v153_v35, %v317_v38  ;;  %vm95_vm5 = vweird.f32 %v267_v0 }
  0x22   :  { %v321_v40 = vmul.u32.u64.low %v284_v22, %v157_v34  ;;  %v322_v41 = vmul.u32.u64.high %v284_v22, %v157_v34, %v321_v40  ;;  %v165_v22 = vmul.u32 %v284_v22, %v149_v33  ;;  %vm202_vm9 = vweird.f32 %v272_v1 }
  0x23   :  { %v65_v42 = vshrl.u32 %v64_v37, 30  ;;  %v168_v44 = vadd.s32 1, %v318_v39 }
  0x24   :  { %vm167_vm11 = vc.u32 %v322_v41, %v317_v38  ;;  %v166_v11 = vadd.s32 %v317_v38, %v322_v41 }
  0x25   :  { %v66_v43 = vshll.u32 %v65_v42, 30  ;;  %v169_v46 = vsel %vm167_vm11, %v168_v44, %v318_v39  ;;  %v89_v13 = vsub.s32 4, %v65_v42 }
  0x26   :  { %v170_v47 = vadd.s32 %v169_v46, %v165_v22 }
  0x27   :  { %v67_v45 = vsub.s32 %v63_v29, %v66_v43  ;;  %v90_v21 = vsel %vm5_vm14, %v89_v13, %v65_v42 }
  0x28   :  { %v171_v49 = vadd.s32 536870912, %v170_v47  ;;  %v92_v27 = vsel %vm4_vm15, 0, %v90_v21 }
  0x29   :  { %v69_v48 = vsub.s32 0, %v67_v45  ;;  %v96_v32 = vadd.s32 3, %v92_v27 }
  0x2a   :  { %v172_v51 = vshrl.u32 %v171_v49, 30 }
  0x2b   :  { %v217_v50 = vmin.u32 %v69_v48, %v67_v45  ;;  %v97_v36 = vand.u32 3, %v96_v32 }
  0x2c   :  { %v173_v53 = vshll.u32 %v172_v51, 30  ;;  %v196_v31 = vsub.s32 4, %v172_v51 }
  0x2d   :  { %v71_v52 = vclz %v217_v50  ;;  %vm102_vm2 = vcmp.eq.s32.totalorder %v97_v36, 2  ;;  %vm99_vm3 = vcmp.eq.s32.totalorder %v97_v36, 0  ;;  %vm98_vm4 = vcmp.lt.s32.totalorder %v97_v36, 2 }
  0x2e   :  { %v174_v55 = vsub.s32 %v170_v47, %v173_v53  ;;  %v197_v35 = vsel %vm112_vm0, %v196_v31, %v172_v51 }
  0x2f   :  { %v218_v54 = vadd.s32 4294967294, %v71_v52  ;;  %v199_v38 = vsel %vm111_vm1, 0, %v197_v35 }
  0x30   :  { %v176_v58 = vsub.s32 0, %v174_v55  ;;  %v203_v42 = vadd.s32 3, %v199_v38 }
  0x31   :  { %vm219_vm12 = vcmp.lt.s32.totalorder %v218_v54, 0 }
  0x32   :  { %v74_v57 = vsel %vm219_vm12, 0, %v218_v54  ;;  %v222_v62 = vmin.u32 %v176_v58, %v174_v55 }
  0x33   :  { %v75_v59 = vsub.s32 32, %v74_v57  ;;  %v76_v60 = vshll.u32 %v67_v45, %v74_v57  ;;  %v79_v61 = vsub.s32 4294967266, %v74_v57  ;;  %v204_v45 = vand.u32 3, %v203_v42 }
  0x34   :  { %v178_v5 = vclz %v222_v62 }
  0x35   :  { %v77_v63 = vshrl.u32 %v59_v56, %v75_v59  ;;  %v80_v3 = vadd.s32 127, %v79_v61  ;;  %vm209_vm6 = vcmp.eq.s32.totalorder %v204_v45, 2  ;;  %vm206_vm7 = vcmp.eq.s32.totalorder %v204_v45, 0 }
  0x36   :  { %v223_v8 = vadd.s32 4294967294, %v178_v5  ;;  %vm205_vm8 = vcmp.lt.s32.totalorder %v204_v45, 2 }
  0x37   :  { %v78_v6 = vor.u32 %v77_v63, %v76_v60  ;;  %v81_v7 = vshll.u32 %v80_v3, 23 }
  0x38   :  { %vm224_vm13 = vcmp.lt.s32.totalorder %v223_v8, 0 }
  0x39   :  { %v82_v9 = vor.u32 4788187, %v81_v7  ;;  %v85_v10 = vcvt.s32.f32 %v78_v6  ;;  %v181_v14 = vsel %vm224_vm13, 0, %v223_v8 }
  0x3a   :  { %v182_v15 = vsub.s32 32, %v181_v14  ;;  %v183_v16 = vshll.u32 %v174_v55, %v181_v14  ;;  %v186_v17 = vsub.s32 4294967266, %v181_v14 }
  0x3b   :  { %v83_v12 = vand.u32 2147483647, %v82_v9 }
  0x3c   :  { %v184_v19 = vshrl.u32 %v166_v11, %v182_v15  ;;  %v187_v20 = vadd.s32 127, %v186_v17 }
  0x3d   :  { %v86_v18 = vmul.f32 %v85_v10, %v83_v12 }
  0x3e   :  { %v185_v23 = vor.u32 %v184_v19, %v183_v16  ;;  %v188_v24 = vshll.u32 %v187_v20, 23 }
  0x3f   :  { %v87_v2 = vxor.u32 2147483648, %v86_v18 }
  0x40   :  { %v189_v28 = vor.u32 4788187, %v188_v24  ;;  %v192_v29 = vcvt.s32.f32 %v185_v23 }
  0x41   :  { %v88_v25 = vsel %vm5_vm14, %v87_v2, %v86_v18 }
  0x42   :  { %v91_v26 = vsel %vm4_vm15, %v267_v0, %v88_v25  ;;  %v190_v30 = vand.u32 2147483647, %v189_v28 }
  0x43   :  { %240 = vcosq.f32 %v91_v26 }
  0x44   :  { %242 = vsinq.f32 %v91_v26  ;;  %v193_v33 = vmul.f32 %v192_v29, %v190_v30 }
  0x46   :  { %v194_v4 = vxor.u32 2147483648, %v193_v33 }
  0x48   :  { %v195_v37 = vsel %vm112_vm0, %v194_v4, %v193_v33 }
  0x49   :  { %v198_v34 = vsel %vm111_vm1, %v272_v1, %v195_v37 }
  0x4a   :  { %244 = vcosq.f32 %v198_v34 }
  0x4b   :  { %246 = vsinq.f32 %v198_v34 }
  0x4d   :  { %v241_v39 = vpop.eup %240 }
  0x4e   :  { %v243_v40 = vpop.eup %242  ;;  %v103_v41 = vxor.u32 2147483648, %v241_v39 }
  0x4f   :  { %v100_v22 = vxor.u32 2147483648, %v243_v40 }
  0x50   :  { %v104_v0 = vsel %vm102_vm2, %v103_v41, %v243_v40 }
  0x51   :  { %v101_v43 = vsel %vm99_vm3, %v241_v39, %v100_v22 }
  0x52   :  { %v105_v44 = vsel %vm98_vm4, %v101_v43, %v104_v0 }
  0x53   :  { %v106_v46 = vsel %vm95_vm5, nan, %v105_v44 }
  0x54   :  { %107 = vst [vmem:[%s347_s1] sm:$0xff] %v106_v46  ;;  %v245_v47 = vpop.eup %244 }
  0x55   :  { %v247_v48 = vpop.eup %246  ;;  %v210_v49 = vxor.u32 2147483648, %v245_v47 }
  0x56   :  { %v207_v50 = vxor.u32 2147483648, %v247_v48 }
  0x57   :  { %v211_v1 = vsel %vm209_vm6, %v210_v49, %v247_v48 }
  0x58   :  { %v208_v51 = vsel %vm206_vm7, %v245_v47, %v207_v50 }
  0x59   :  { %v212_v52 = vsel %vm205_vm8, %v208_v51, %v211_v1 }
  0x5a   :  { %v213_v53 = vsel %vm202_vm9, nan, %v212_v52 }
  0x5b   :  { %225 = vst [vmem:[%s347_s1 + $0x8] sm:$0xff] %v213_v53 }

// kernel: cos.1
= control target key start
LH: loop header
LB: loop body
LE: loop exit
PB: predicated region body
PF: predicated region fallthrough
CT: control target
= control target key end

     0   :  { %v246_v24 = vmov 683565275   ;;  %v247_v26 = vmov 2475754826   ;;  %v248_v28 = vmov 2131351028   ;;  %s360_s0 = inlined_call_operand.vmem [shape: f32[2,8,16], index: 0, kind: input, shape index: {}]   ;;  %s361_s1 = inlined_call_operand.vmem [shape: f32[2,8,16], index: 1, kind: output, shape index: {}]  }
   0x1   :  { %v265_v0 = vld [vmem:[%s360_s0] sm:$0xff]  ;;  %v270_v1 = vld [vmem:[%s360_s0 + $0x8] sm:$0xff]  ;;  %v249_v30 = vmov 2102212464   ;;  %v250_v32 = vmov 920167782  }
   0x2   :  { %v3_v2 = vand.u32 2147483647, %v265_v0  ;;  %v6_v3 = vand.u32 2139095040, %v265_v0  ;;  %v109_v4 = vand.u32 2147483647, %v270_v1  ;;  %v112_v5 = vand.u32 2139095040, %v270_v1 }
   0x3   :  { %v251_v40 = vmov 1326507024   ;;  %vm5_vm14 = vcmp.lt.s32.totalorder %v265_v0, 0 }
   0x4   :  { %v7_v6 = vshrl.u32 %v6_v3, 23  ;;  %v10_v7 = vand.u32 8388607, %v3_v2  ;;  %v113_v8 = vshrl.u32 %v112_v5, 23  ;;  %v116_v9 = vand.u32 8388607, %v109_v4 }
   0x5   :  { %vm331_vm15 = vcmp.le.f32.partialorder %v3_v2, 0.7853982 }
   0x6   :  { %v214_v10 = vadd.s32 4294967169, %v7_v6  ;;  %v219_v11 = vadd.s32 4294967169, %v113_v8  ;;  %v11_v13 = vor.u32 8388608, %v10_v7  ;;  %v117_v14 = vor.u32 8388608, %v116_v9 }
   0x8   :  { %v13_v12 = vadd.s32 1, %v214_v10  ;;  %v119_v15 = vadd.s32 1, %v219_v11  ;;  %v280_v20 = vshll.u32 %v11_v13, 8  ;;  %v282_v22 = vshll.u32 %v117_v14, 8 }
   0xa   :  { %vm14_vm0 = vcmp.gt.s32.totalorder %v13_v12, 0  ;;  %vm120_vm1 = vcmp.gt.s32.totalorder %v119_v15, 0 }
   0xb   :  { %v15_v16 = vsel %vm14_vm0, %v13_v12, 0  ;;  %v121_v19 = vsel %vm120_vm1, %v119_v15, 0  ;;  %vm111_vm0 = vcmp.lt.s32.totalorder %v270_v1, 0  ;;  %vm343_vm1 = vcmp.le.f32.partialorder %v109_v4, 0.7853982 }
   0xc   :  { %v16_v17 = vshrl.u32 %v15_v16, 5  ;;  %v17_v18 = vand.u32 31, %v15_v16  ;;  %v123_v21 = vand.u32 31, %v121_v19  ;;  %v284_v34 = vshrl.u32 %v121_v19, 5 }
   0xe   :  { %v18_v23 = vsub.s32 32, %v17_v18  ;;  %v20_v25 = vshll.u32 %v246_v24, %v17_v18  ;;  %v23_v27 = vshll.u32 %v247_v26, %v17_v18  ;;  %v26_v29 = vshll.u32 %v248_v28, %v17_v18 }
   0xf   :  { %v29_v31 = vshll.u32 %v249_v30, %v17_v18  ;;  %v32_v33 = vshll.u32 %v250_v32, %v17_v18  ;;  %vm35_vm2 = vcmp.lt.s32.totalorder %v16_v17, 1  ;;  %vm36_vm3 = vcmp.lt.s32.totalorder %v16_v17, 2 }
  0x10   :  { %v19_v35 = vshrl.u32 %v246_v24, %v18_v23  ;;  %v21_v36 = vshrl.u32 %v247_v26, %v18_v23  ;;  %v24_v37 = vshrl.u32 %v248_v28, %v18_v23  ;;  %v27_v38 = vshrl.u32 %v249_v30, %v18_v23 }
  0x11   :  { %v30_v39 = vshrl.u32 %v250_v32, %v18_v23  ;;  %v33_v41 = vshrl.u32 %v251_v40, %v18_v23  ;;  %vm38_vm4 = vcmp.lt.s32.totalorder %v16_v17, 4  ;;  %v124_v45 = vsub.s32 32, %v123_v21 }
  0x12   :  { %v22_v42 = vor.u32 %v21_v36, %v20_v25  ;;  %v25_v43 = vor.u32 %v24_v37, %v23_v27  ;;  %v28_v44 = vor.u32 %v27_v38, %v26_v29  ;;  %vm37_vm5 = vcmp.lt.s32.totalorder %v16_v17, 3 }
  0x13   :  { %v31_v46 = vor.u32 %v30_v39, %v29_v31  ;;  %v34_v47 = vor.u32 %v33_v41, %v32_v33  ;;  %v126_v48 = vshll.u32 %v246_v24, %v123_v21  ;;  %v129_v56 = vshll.u32 %v247_v26, %v123_v21 }
  0x14   :  { %v39_v49 = vsel %vm35_vm2, %v19_v35, %v22_v42  ;;  %v40_v50 = vsel %vm38_vm4, %v28_v44, 2102212464  ;;  %v43_v51 = vsel %vm35_vm2, %v22_v42, %v25_v43  ;;  %v47_v52 = vsel %vm35_vm2, %v25_v43, %v28_v44 }
  0x15   :  { %v41_v53 = vsel %vm37_vm5, %v25_v43, %v40_v50  ;;  %v44_v54 = vsel %vm38_vm4, %v31_v46, 920167782  ;;  %v48_v55 = vsel %vm38_vm4, %v34_v47, 1326507024  ;;  %v125_v59 = vshrl.u32 %v246_v24, %v124_v45 }
  0x16   :  { %v45_v57 = vsel %vm37_vm5, %v28_v44, %v44_v54  ;;  %v49_v58 = vsel %vm37_vm5, %v31_v46, %v48_v55  ;;  %v127_v60 = vshrl.u32 %v247_v26, %v124_v45  ;;  %v42_v61 = vsel %vm36_vm3, %v39_v49, %v41_v53 }
  0x17   :  { %v46_v62 = vsel %vm36_vm3, %v43_v51, %v45_v57  ;;  %v50_v63 = vsel %vm36_vm3, %v47_v52, %v49_v58  ;;  %v130_v3 = vshrl.u32 %v248_v28, %v124_v45  ;;  %v132_v11 = vshll.u32 %v248_v28, %v123_v21 }
  0x18   :  { %v293_v5 = vmul.u32.u64.low %v280_v20, %v50_v63  ;;  %v294_v6 = vmul.u32.u64.high %v280_v20, %v50_v63, %v293_v5  ;;  %v297_v7 = vmul.u32.u64.low %v280_v20, %v46_v62  ;;  %v298_v8 = vmul.u32.u64.high %v280_v20, %v46_v62, %v297_v7 }
  0x19   :  { %v128_v9 = vor.u32 %v127_v60, %v126_v48  ;;  %v131_v10 = vor.u32 %v130_v3, %v129_v56  ;;  %v133_v12 = vshrl.u32 %v249_v30, %v124_v45  ;;  %v135_v13 = vshll.u32 %v249_v30, %v123_v21 }
  0x1a   :  { %v136_v14 = vshrl.u32 %v250_v32, %v124_v45  ;;  %v138_v15 = vshll.u32 %v250_v32, %v123_v21  ;;  %v139_v16 = vshrl.u32 %v251_v40, %v124_v45  ;;  %v58_v17 = vmul.u32 %v280_v20, %v42_v61 }
  0x1b   :  { %v134_v18 = vor.u32 %v133_v12, %v132_v11  ;;  %vm141_vm6 = vcmp.lt.s32.totalorder %v284_v34, 1  ;;  %vm142_vm7 = vcmp.lt.s32.totalorder %v284_v34, 2  ;;  %vm60_vm8 = vc.u32 %v294_v6, %v297_v7 }
  0x1c   :  { %v61_v19 = vadd.s32 1, %v298_v8  ;;  %v137_v20 = vor.u32 %v136_v14, %v135_v13  ;;  %vm143_vm9 = vcmp.lt.s32.totalorder %v284_v34, 3  ;;  %v140_v21 = vor.u32 %v139_v16, %v138_v15 }
  0x1d   :  { %vm144_vm10 = vcmp.lt.s32.totalorder %v284_v34, 4  ;;  %v145_v23 = vsel %vm141_vm6, %v125_v59, %v128_v9  ;;  %v149_v24 = vsel %vm141_vm6, %v128_v9, %v131_v10  ;;  %v153_v28 = vsel %vm141_vm6, %v131_v10, %v134_v18 }
  0x1e   :  { %v62_v25 = vsel %vm60_vm8, %v61_v19, %v298_v8  ;;  %v146_v26 = vsel %vm144_vm10, %v134_v18, 2102212464  ;;  %v150_v27 = vsel %vm144_vm10, %v137_v20, 920167782  ;;  %v154_v32 = vsel %vm144_vm10, %v140_v21, 1326507024 }
  0x1f   :  { %v63_v29 = vadd.s32 %v62_v25, %v58_v17  ;;  %v147_v30 = vsel %vm143_vm9, %v131_v10, %v146_v26  ;;  %v151_v31 = vsel %vm143_vm9, %v134_v18, %v150_v27  ;;  %v155_v36 = vsel %vm143_vm9, %v137_v20, %v154_v32 }
  0x20   :  { %v148_v33 = vsel %vm142_vm7, %v145_v23, %v147_v30  ;;  %v152_v35 = vsel %vm142_vm7, %v149_v24, %v151_v31  ;;  %v156_v34 = vsel %vm142_vm7, %v153_v28, %v155_v36  ;;  %v59_v56 = vadd.s32 %v297_v7, %v294_v6 }
  0x21   :  { %v64_v37 = vadd.s32 536870912, %v63_v29  ;;  %v315_v38 = vmul.u32.u64.low %v282_v22, %v152_v35  ;;  %v316_v39 = vmul.u32.u64.high %v282_v22, %v152_v35, %v315_v38  ;;  %vm95_vm5 = vweird.f32 %v265_v0 }
  0x22   :  { %v319_v40 = vmul.u32.u64.low %v282_v22, %v156_v34  ;;  %v320_v41 = vmul.u32.u64.high %v282_v22, %v156_v34, %v319_v40  ;;  %v164_v22 = vmul.u32 %v282_v22, %v148_v33  ;;  %vm201_vm9 = vweird.f32 %v270_v1 }
  0x23   :  { %v65_v42 = vshrl.u32 %v64_v37, 30  ;;  %v167_v44 = vadd.s32 1, %v316_v39 }
  0x24   :  { %vm166_vm11 = vc.u32 %v320_v41, %v315_v38  ;;  %v165_v11 = vadd.s32 %v315_v38, %v320_v41 }
  0x25   :  { %v66_v43 = vshll.u32 %v65_v42, 30  ;;  %v168_v46 = vsel %vm166_vm11, %v167_v44, %v316_v39  ;;  %v89_v21 = vsub.s32 4, %v65_v42 }
  0x26   :  { %v169_v47 = vadd.s32 %v168_v46, %v164_v22 }
  0x27   :  { %v67_v45 = vsub.s32 %v63_v29, %v66_v43  ;;  %v90_v29 = vsel %vm5_vm14, %v89_v21, %v65_v42 }
  0x28   :  { %v170_v49 = vadd.s32 536870912, %v169_v47  ;;  %v92_v31 = vsel %vm331_vm15, 0, %v90_v29 }
  0x29   :  { %v69_v48 = vsub.s32 0, %v67_v45  ;;  %v96_v36 = vand.u32 3, %v92_v31 }
  0x2a   :  { %v171_v51 = vshrl.u32 %v170_v49, 30 }
  0x2b   :  { %v215_v50 = vmin.u32 %v69_v48, %v67_v45  ;;  %vm101_vm2 = vcmp.eq.s32.totalorder %v96_v36, 2  ;;  %vm98_vm3 = vcmp.eq.s32.totalorder %v96_v36, 0  ;;  %vm97_vm4 = vcmp.lt.s32.totalorder %v96_v36, 2 }
  0x2c   :  { %v172_v53 = vshll.u32 %v171_v51, 30  ;;  %v195_v35 = vsub.s32 4, %v171_v51 }
  0x2d   :  { %v71_v52 = vclz %v215_v50 }
  0x2e   :  { %v173_v55 = vsub.s32 %v169_v47, %v172_v53  ;;  %v196_v38 = vsel %vm111_vm0, %v195_v35, %v171_v51 }
  0x2f   :  { %v216_v54 = vadd.s32 4294967294, %v71_v52  ;;  %v198_v22 = vsel %vm343_vm1, 0, %v196_v38 }
  0x30   :  { %v175_v58 = vsub.s32 0, %v173_v55 }
  0x31   :  { %vm217_vm12 = vcmp.lt.s32.totalorder %v216_v54, 0 }
  0x32   :  { %v74_v57 = vsel %vm217_vm12, 0, %v216_v54  ;;  %v220_v62 = vmin.u32 %v175_v58, %v173_v55 }
  0x33   :  { %v75_v59 = vsub.s32 32, %v74_v57  ;;  %v76_v60 = vshll.u32 %v67_v45, %v74_v57  ;;  %v79_v61 = vsub.s32 4294967266, %v74_v57  ;;  %v202_v45 = vand.u32 3, %v198_v22 }
  0x34   :  { %v177_v5 = vclz %v220_v62 }
  0x35   :  { %v77_v63 = vshrl.u32 %v59_v56, %v75_v59  ;;  %v80_v3 = vadd.s32 127, %v79_v61  ;;  %vm207_vm6 = vcmp.eq.s32.totalorder %v202_v45, 2  ;;  %vm204_vm7 = vcmp.eq.s32.totalorder %v202_v45, 0 }
  0x36   :  { %v221_v8 = vadd.s32 4294967294, %v177_v5  ;;  %vm203_vm8 = vcmp.lt.s32.totalorder %v202_v45, 2 }
  0x37   :  { %v78_v6 = vor.u32 %v77_v63, %v76_v60  ;;  %v81_v7 = vshll.u32 %v80_v3, 23 }
  0x38   :  { %vm222_vm13 = vcmp.lt.s32.totalorder %v221_v8, 0 }
  0x39   :  { %v82_v9 = vor.u32 4788187, %v81_v7  ;;  %v85_v10 = vcvt.s32.f32 %v78_v6  ;;  %v180_v13 = vsel %vm222_vm13, 0, %v221_v8 }
  0x3a   :  { %v181_v14 = vsub.s32 32, %v180_v13  ;;  %v182_v15 = vshll.u32 %v173_v55, %v180_v13  ;;  %v185_v16 = vsub.s32 4294967266, %v180_v13 }
  0x3b   :  { %v83_v12 = vand.u32 2147483647, %v82_v9 }
  0x3c   :  { %v183_v18 = vshrl.u32 %v165_v11, %v181_v14  ;;  %v186_v19 = vadd.s32 127, %v185_v16 }
  0x3d   :  { %v86_v17 = vmul.f32 %v85_v10, %v83_v12 }
  0x3e   :  { %v184_v23 = vor.u32 %v183_v18, %v182_v15  ;;  %v187_v24 = vshll.u32 %v186_v19, 23 }
  0x3f   :  { %v87_v20 = vxor.u32 2147483648, %v86_v17 }
  0x40   :  { %v188_v27 = vor.u32 4788187, %v187_v24  ;;  %v191_v28 = vcvt.s32.f32 %v184_v23 }
  0x41   :  { %v88_v25 = vsel %vm5_vm14, %v87_v20, %v86_v17 }
  0x42   :  { %v91_v26 = vsel %vm331_vm15, %v265_v0, %v88_v25  ;;  %v189_v30 = vand.u32 2147483647, %v188_v27 }
  0x43   :  { %238 = vcosq.f32 %v91_v26 }
  0x44   :  { %240 = vsinq.f32 %v91_v26  ;;  %v192_v32 = vmul.f32 %v191_v28, %v189_v30 }
  0x46   :  { %v193_v33 = vxor.u32 2147483648, %v192_v32 }
  0x48   :  { %v194_v37 = vsel %vm111_vm0, %v193_v33, %v192_v32 }
  0x49   :  { %v197_v34 = vsel %vm343_vm1, %v270_v1, %v194_v37 }
  0x4a   :  { %242 = vcosq.f32 %v197_v34 }
  0x4b   :  { %244 = vsinq.f32 %v197_v34 }
  0x4d   :  { %v239_v39 = vpop.eup %238 }
  0x4e   :  { %v241_v40 = vpop.eup %240  ;;  %v102_v41 = vxor.u32 2147483648, %v239_v39 }
  0x4f   :  { %v99_v42 = vxor.u32 2147483648, %v241_v40 }
  0x50   :  { %v103_v0 = vsel %vm101_vm2, %v102_v41, %v241_v40 }
  0x51   :  { %v100_v43 = vsel %vm98_vm3, %v239_v39, %v99_v42 }
  0x52   :  { %v104_v44 = vsel %vm97_vm4, %v100_v43, %v103_v0 }
  0x53   :  { %v105_v46 = vsel %vm95_vm5, nan, %v104_v44 }
  0x54   :  { %106 = vst [vmem:[%s361_s1] sm:$0xff] %v105_v46  ;;  %v243_v47 = vpop.eup %242 }
  0x55   :  { %v245_v48 = vpop.eup %244  ;;  %v208_v49 = vxor.u32 2147483648, %v243_v47 }
  0x56   :  { %v205_v50 = vxor.u32 2147483648, %v245_v48 }
  0x57   :  { %v209_v1 = vsel %vm207_vm6, %v208_v49, %v245_v48 }
  0x58   :  { %v206_v51 = vsel %vm204_vm7, %v243_v47, %v205_v50 }
  0x59   :  { %v210_v52 = vsel %vm203_vm8, %v206_v51, %v209_v1 }
  0x5a   :  { %v211_v53 = vsel %vm201_vm9, nan, %v210_v52 }
  0x5b   :  { %223 = vst [vmem:[%s361_s1 + $0x8] sm:$0xff] %v211_v53 }

// kernel: transformer_forward.1
= control target key start
LH: loop header
LB: loop body
LE: loop exit
PB: predicated region body
PF: predicated region fallthrough
CT: control target
= control target key end

     0   :  { %s2927_s0 = inlined_call_operand.vmem [shape: f32[2,8,128], index: 0, kind: input, shape index: {}]   ;;  %s2928_s1 = inlined_call_operand.vmem [shape: f32[8,8], index: 1, kind: input, shape index: {}]   ;;  %s2929_s2 = inlined_call_operand.vmem [shape: bf16[2,128,256], index: 2, kind: input, shape index: {}]   ;;  %s2930_s3 = inlined_call_operand.hbm [shape: bf16[2,64,128], index: 3, kind: input, shape index: {}]   ;;  %s2931_s4 = inlined_call_operand.vmem [shape: f32[2,8,128], index: 4, kind: input, shape index: {}]   ;;  %s2932_s5 = inlined_call_operand.vmem [shape: bf16[2,128,128], index: 5, kind: input, shape index: {}]   ;;  %s2933_s6 = inlined_call_operand.hbm [shape: bf16[2,128,128], index: 6, kind: input, shape index: {}]   ;;  %s2934_s7 = inlined_call_operand.hbm [shape: bf16[128,128], index: 7, kind: input, shape index: {}]   ;;  %s2935_s8 = inlined_call_operand.vmem [shape: f32[1,128], index: 8, kind: input, shape index: {}]   ;;  %s2936_s9 = inlined_call_operand.hbm [shape: f32[2,1,128], index: 9, kind: output, shape index: {}]  }
   0x1   :  { %2947 = sst [smem:[#allocation17_spill]] %s2930_s3 }
   0x2   :  { %2948 = sst [smem:[#allocation18_spill]] %s2934_s7 }
   0x3   :  { %2949 = sst [smem:[#allocation19_spill]] %s2936_s9 }
   0x4   :  { %14 = vsyncpa [#allocation4], 0 }
   0x5   :  { %16 = vsyncpa [#allocation4 + $0x1], 0 }
   0x6   :  { %17 = vsyncpa [#allocation7], 0 }
   0x7   :  { %19 = vsyncpa [#allocation7 + $0x1], 0 }
   0x8   :  { %20 = vsyncpa [#allocation5], 0  ;;  %s2479_s30 = smov 0   ;;  %s2481_s10 = smov 0  }
   0x9   :  { %s2483_s11 = smov 0   ;;  %s2485_s12 = smov 0  }
   0xa   :  { %s2487_s13 = smov 0   ;;  %s2489_s14 = smov 0  }
   0xb LB: > { %2950 = sst [smem:[#allocation14_spill]] %s2398_s11  ;;  %s2508_s15 = sadd.s32 4294967295, %s2410_s14   ;;  %s2410_s14 = sphi %s2489_s14, %s26_s14   ;;  %s2406_s13 = sphi %s2487_s13, %s2973_s13   ;;  %s2402_s12 = sphi %s2485_s12, %s2972_s12   ;;  %s2398_s11 = sphi %s2483_s11, %s2968_s11   ;;  %s2394_s10 = sphi %s2481_s10, %s2971_s10   ;;  %s2390_s30 = sphi %s2479_s30, %s2970_s30  }
   0xc   : > { %p131_p0 = scmp.ne.s32.totalorder %s2394_s10, %s2390_s30  ;;  %p2937_p1 = scmp.eq.s32.totalorder %s2508_s15, 0 }
   0xd   : > { %p1805_p2 = scmp.ge.s32.totalorder %s2410_s14, 1  ;;  %p288_p3 = scmp.lt.s32.totalorder %s2410_s14, 3 }
   0xe   : > { %p2516_p4 = por %p2937_p1, %p131_p0  ;;  %s2412_s18 = smov [#allocation8]  }
   0xf   : > { %p2520_p5 = pnand %p1805_p2, %p288_p3  ;;  %s312_s19 = sshll.u32 %s2412_s18, 4  ;;  %s313_s19 = int_to_ptr.vmem [resolvable:$true] %s312_s19 }
  0x10   : > { %s2951_s16 = scalar_select %p2516_p4, 1, 0 }
  0x11   : > { %s2952_s17 = scalar_select %p2520_p5, 1, 0 }
  0x12   : > { %p2070_p6 = pneg %p2520_p5  ;;  %s35_s21 = sadd.s32 1, %s2406_s13 }
  0x13   : > { %s2954_s7 = sld [smem:[#allocation18_spill]] }
  0x14   : > { %p2528_p7 = pnand %p2070_p6, %p2937_p1 }
  0x16   : > { %p2236_p9 = pneg %p2528_p7 }
  0x19   : > { %s2234_s24 = scalar_lea.hbm %s2954_s7, 1024 }
  0x1a   : > { %p2235_p8 = scmp.ne.s32.totalorder %s2954_s7, %s2234_s24  ;;  %p2241_p12 = scmp.lt.u32.totalorder %s2234_s24, %s2954_s7 }
  0x1c   : > { %p2237_p10 = pnand %p2236_p9, %p2235_p8 }
  0x1e   : > { %p2238_p11 = pneg %p2237_p10 }
  0x20   : > { %p2243_p13 = pnand %p2241_p12, %p2238_p11 }
  0x22   : > { %2246 = shalt.err (!%p2243_p13)
}
  0x23   : > { %s2247_s29 = scalar_lea.vmem %s313_s19, 1024  ;;  %p2255_p6 = scmp.lt.s32.totalorder %s313_s19, %s313_s19 }
  0x24   : > { %p2248_p0 = scmp.ne.s32.totalorder %s313_s19, %s2247_s29  ;;  %p2256_p1 = scmp.lt.s32.totalorder %s2247_s29, %s2247_s29 }
  0x26   : > { %p2250_p2 = pnand %p2248_p0, %p2236_p9  ;;  %p2257_p4 = por %p2256_p1, %p2255_p6 }
  0x28   : > { %p2251_p3 = pneg %p2250_p2 }
  0x2a   : > { %p2258_p5 = pnand %p2257_p4, %p2251_p3 }
  0x2c   : > { %2261 = shalt.err (!%p2258_p5)
}
  0x2d   : > { %s2940_s30 = smov 64   ;;  %s2942_s18 = smov 4  }
  0x2e   : > { %2073 = dma.hbm_to_vmem [thread:$0]  (!%p2528_p7), %s2954_s7, 1024, %s313_s19, [#allocation7], %s2940_s30, %s2940_s30, %s2942_s18  }
  0x2f   : > { %p36_p1 = scmp.ge.s32.totalorder %s35_s21, 2  ;;  %s118_s24 = sadd.s32 1, %s2398_s11 }
  0x30   : > { %p125_p4 = scmp.ne.s32.totalorder %s2398_s11, %s2394_s10  ;;  %p126_p5 = scmp.eq.s32.totalorder %s2410_s14, 0 }
  0x31   : > { %s2975_s21 = smov (%p36_p1, %s35_s21), 0  ;;  %p2082_p9 = scmp.lt.s32.totalorder %s2410_s14, 2 }
  0x32   : > { %2955 = sst [smem:[#allocation15_spill]] %s2975_s21  ;;  %p127_p8 = por %p126_p5, %p125_p4 }
  0x33   : > { %s115_s25 = ssub.s32 %s2406_s13, %s2975_s21  ;;  %s2562_s26 = sand.u32 1, %s2398_s11  }
  0x34   : > { %p116_p10 = scmp.eq.s32.totalorder %s115_s25, 0  ;;  %s1809_s20 = sshll.u32 %s2562_s26, 5 }
  0x35   : > { %s1886_s27 = sshll.u32 %s2406_s13, 9  ;;  %s2957_s3 = sld [smem:[#allocation17_spill]] }
  0x36   : > { %s2567_s28 = scalar_select %p116_p10, %s2398_s11, %s118_s24  }
  0x37   : > { %s341_s23 = scalar_lea.vmem [#allocation3], %s1809_s20  ;;  %p2574_p7 = pnand %p2082_p9, %p127_p8 }
  0x38   : > { %2956 = sst [smem:[#allocation16_spill]] %s2567_s28  ;;  %s348_s30 = sshll.u32 %s341_s23, 4  ;;  %s2578_s30 = int_to_ptr.vmem [resolvable:$true] %s348_s30 }
  0x39   : > { %s338_s25 = scalar_lea.sflag [#allocation4], %s2562_s26  ;;  %p2264_p12 = pneg %p2574_p7 }
  0x3b   : > { %s2572_s22 = scalar_lea.hbm %s2957_s3, %s1886_s27  ;;  %s2267_s19 = scalar_lea.hbm %s2957_s3, 1024 }
  0x3c   : > { %s2262_s7 = scalar_lea.hbm %s2572_s22, 512  ;;  %p2268_p2 = scmp.lt.u32.totalorder %s2572_s22, %s2957_s3 }
  0x3d   : > { %p2263_p11 = scmp.ne.s32.totalorder %s2572_s22, %s2262_s7  ;;  %p2269_p3 = scmp.lt.u32.totalorder %s2267_s19, %s2262_s7 }
  0x3e   : > { %p2271_p1 = scmp.lt.u32.totalorder %s2262_s7, %s2572_s22 }
  0x3f   : > { %p2265_p13 = pnand %p2264_p12, %p2263_p11  ;;  %p2270_p6 = por %p2269_p3, %p2268_p2 }
  0x41   : > { %p2266_p0 = pneg %p2265_p13  ;;  %p2272_p4 = por %p2271_p1, %p2270_p6 }
  0x43   : > { %p2273_p5 = pnand %p2272_p4, %p2266_p0 }
  0x45   : > { %2276 = shalt.err (!%p2273_p5)
}
  0x46   : > { %s2277_s24 = scalar_lea.vmem %s2578_s30, 512  ;;  %s2415_s20 = smov [#allocation3]  }
  0x47   : > { %p2278_p8 = scmp.ne.s32.totalorder %s2578_s30, %s2277_s24  ;;  %s2282_s27 = sshll.u32 %s2415_s20, 4  ;;  %s2283_s27 = int_to_ptr.vmem [resolvable:$false] %s2282_s27 }
  0x48   : > { %s2284_s29 = scalar_lea.vmem %s2283_s27, 1024  ;;  %p2285_p11 = scmp.lt.s32.totalorder %s2578_s30, %s2283_s27 }
  0x49   : > { %p2280_p9 = pnand %p2278_p8, %p2264_p12  ;;  %p2286_p13 = scmp.lt.s32.totalorder %s2284_s29, %s2277_s24 }
  0x4b   : > { %p2281_p10 = pneg %p2280_p9  ;;  %p2287_p2 = por %p2286_p13, %p2285_p11 }
  0x4d   : > { %p2288_p3 = pnand %p2287_p2, %p2281_p10 }
  0x4f   : > { %2291 = shalt.err (!%p2288_p3)
}
  0x50   : > { %s2959_s7 = smov 4   ;;  %s2960_s19 = smov 64  }
  0x51   : > { %2077 = dma.hbm_to_vmem [thread:$0]  (!%p2574_p7), %s2572_s22, 512, %s2578_s30, %s338_s25, %s2960_s19, %s2960_s19, %s2959_s7  }
  0x52   : > { %s1812_s23 = sshll.u32 %s2562_s26, 6  ;;  %s1887_s20 = sshll.u32 %s2406_s13, 10 }
  0x53   : > { %s2617_s29 = scalar_lea.hbm %s2933_s6, %s1887_s20  ;;  %s377_s3 = scalar_lea.vmem [#allocation6], %s1812_s23 }
  0x54   : > { %s384_s21 = sshll.u32 %s377_s3, 4  ;;  %s2961_s28 = sand.u32 1, %s2410_s14   ;;  %s2619_s21 = int_to_ptr.vmem [resolvable:$true] %s384_s21 }
  0x55   : > { %s2623_s11 = scalar_lea.sflag [#allocation7], %s2961_s28  ;;  %s2292_s9 = scalar_lea.hbm %s2617_s29, 1024 }
  0x56   : > { %p2293_p0 = scmp.ne.s32.totalorder %s2617_s29, %s2292_s9  ;;  %s2297_s22 = scalar_lea.hbm %s2933_s6, 2048 }
  0x57   : > { %p2298_p4 = scmp.lt.u32.totalorder %s2617_s29, %s2933_s6  ;;  %p2299_p5 = scmp.lt.u32.totalorder %s2297_s22, %s2292_s9 }
  0x58   : > { %p2295_p6 = pnand %p2293_p0, %p2264_p12  ;;  %p2301_p9 = scmp.lt.u32.totalorder %s2292_s9, %s2617_s29 }
  0x59   : > { %p2300_p8 = por %p2299_p5, %p2298_p4 }
  0x5a   : > { %p2296_p1 = pneg %p2295_p6 }
  0x5b   : > { %p2302_p10 = por %p2301_p9, %p2300_p8 }
  0x5d   : > { %p2303_p11 = pnand %p2302_p10, %p2296_p1 }
  0x5f   : > { %2306 = shalt.err (!%p2303_p11)
}
  0x60   : > { %s2307_s3 = scalar_lea.vmem %s2619_s21, 1024  ;;  %s2416_s28 = smov [#allocation6]  }
  0x61   : > { %p2308_p13 = scmp.ne.s32.totalorder %s2619_s21, %s2307_s3  ;;  %s2312_s23 = sshll.u32 %s2416_s28, 4  ;;  %s2313_s23 = int_to_ptr.vmem [resolvable:$false] %s2312_s23 }
  0x62   : > { %s2314_s24 = scalar_lea.vmem %s2313_s23, 2048  ;;  %p2315_p0 = scmp.lt.s32.totalorder %s2619_s21, %s2313_s23 }
  0x63   : > { %p2310_p2 = pnand %p2308_p13, %p2264_p12  ;;  %p2316_p6 = scmp.lt.s32.totalorder %s2314_s24, %s2307_s3 }
  0x65   : > { %p2311_p3 = pneg %p2310_p2  ;;  %p2317_p4 = por %p2316_p6, %p2315_p0 }
  0x67   : > { %p2318_p5 = pnand %p2317_p4, %p2311_p3 }
  0x69   : > { %2321 = shalt.err (!%p2318_p5)
}
  0x6a   : > { %2080 = dma.hbm_to_vmem [thread:$0]  (!%p2574_p7), %s2617_s29, 1024, %s2619_s21, %s2623_s11, %s2960_s19, %s2960_s19, %s2959_s7  }
  0x6b   : > { %p2962_p12 = scmp.ne.s32.totalorder %s2952_s17, 0 }
  0x6c   : > { %s398_s9 = sand.u32 (!%p2962_p12), 1, %s2394_s10   ;;  %p2963_p1 = scmp.ne.s32.totalorder (!%p2962_p12), %s2951_s16, 0 }
  0x6d   : > { %396 = sbr.rel (%p2962_p12) target bundleno = 3784 (0xec8), region = 56  ;;  %s1816_s27 = sshll.u32 (!%p2962_p12), %s398_s9, 5 }
  0x6e   : > { %s399_s30 = scalar_lea.sflag (!%p2962_p12), [#allocation4], %s398_s9  ;;  %s2655_s26 = scalar_lea.vmem (!%p2962_p12), [#allocation3], %s1816_s27 }
  0x74   : > { %2373 = dma.done.wait (%p2963_p1), %s399_s30, 512  }
  0x75   : > { %2375 = vsyncadd (%p2963_p1), %s399_s30, 4294966784  ;;  %s407_s18 = sand.u32 1, %s2508_s15   ;;  %s1817_s22 = sshll.u32 %s398_s9, 6 }
  0x76   : > { %s408_s11 = scalar_lea.sflag [#allocation7], %s407_s18  ;;  %s2662_s21 = scalar_lea.vmem [#allocation6], %s1817_s22 }
  0x77   : > { %2377 = dma.done.wait (%p2963_p1), %s408_s11, 1024  }
  0x78   : > { %2379 = vsyncadd (%p2963_p1), %s408_s11, 4294966272  ;;  %p2964_p7 = scmp.eq.s32.totalorder %s2508_s15, 0 }
  0x7a   : > { %2381 = dma.done.wait (%p2964_p7), [#allocation7], 1024   ;;  %p2965_p8 = pmov %p2964_p7 }
  0x7b   : > { %p475_p9 = scmp.lt.s32.totalorder %s2402_s12, 1  ;;  %p1824_p10 = scmp.ne.s32.totalorder %s2402_s12, 0 }
  0x7c   : > { %2383 = vsyncadd (%p2965_p8), [#allocation7], 4294966272  ;;  %v495_v0 = vld [vmem:[%s2927_s0] sm:$0xff] (!%p1824_p10)  ;;  %v496_v1 = vld [vmem:[%s2927_s0 + $0x8] sm:$0xff] (!%p1824_p10) }
  0x7d   : > { %s476_s17 = scalar_select %p475_p9, %s2402_s12, 1 }
  0x7e   : > { %494 = sbr.rel (%p1824_p10) target bundleno = 133 (0x85), region = 72  ;;  %497 = vst [vmem:[#allocation2] sm:$0xff] (!%p1824_p10), %v495_v0  ;;  %498 = vst [vmem:[#allocation2 + $0x8] sm:$0xff] (!%p1824_p10), %v496_v1 }
  0x7f   : > { %s1888_s7 = sshll.u32 %s476_s17, 7  ;;  %s1821_s19 = sshll.u32 %s476_s17, 3 }
  0x80   : > { %s2677_s20 = scalar_lea.vmem %s2929_s2, %s1888_s7  ;;  %s2682_s28 = scalar_lea.vmem %s2931_s4, %s1821_s19 }
  0x81   : > { %s1889_s23 = sshll.u32 %s476_s17, 6 }
  0x82   : > { %s2687_s27 = scalar_lea.vmem %s2932_s5, %s1889_s23 }
  0x85 PF: > { %v2154_v2 = vld [vmem:[%s2677_s20 + $0x4] ss:$8 sps:$4 sm:$0xff]   ;;  %v2156_v3 = vld [vmem:[%s2677_s20] ss:$8 sps:$4 sm:$0xff]   ;;  %v2417_v4 = vmov 0   ;;  %v2418_v22 = vmov 0.0  }
  0x86   : > { %632 = vmatprep.mubr.bf16.mxu0 %v2417_v4  ;;  %600 = vmatprep.subr.bf16.mxu0 %v2154_v2  ;;  %v2157_v5 = vld [vmem:[%s2677_s20 + $0x14] ss:$8 sps:$4 sm:$0xff]   ;;  %v2159_v6 = vld [vmem:[%s2677_s20 + $0x10] ss:$8 sps:$4 sm:$0xff]   ;;  %v2160_v7 = vld [vmem:[%s2677_s20 + $0x24] ss:$8 sps:$4 sm:$0xff]  }
  0x87   : > { %601 = vmatpush1.bf16.msra.mxu0 %v2156_v3  ;;  %v2162_v8 = vld [vmem:[%s2677_s20 + $0x20] ss:$8 sps:$4 sm:$0xff]   ;;  %v2163_v9 = vld [vmem:[%s2677_s20 + $0x34] ss:$8 sps:$4 sm:$0xff]   ;;  %v2165_v10 = vld [vmem:[%s2677_s20 + $0x30] ss:$8 sps:$4 sm:$0xff]   ;;  %1938 = vmatprep.subr.bf16.mxu1 %v2418_v22 }
  0x88   : > { %602 = vmatprep.subr.bf16.mxu0 %v2157_v5  ;;  %v2166_v11 = vld [vmem:[%s2677_s20 + $0x44] ss:$8 sps:$4 sm:$0xff]   ;;  %v2168_v12 = vld [vmem:[%s2677_s20 + $0x40] ss:$8 sps:$4 sm:$0xff]   ;;  %v2169_v13 = vld [vmem:[%s2677_s20 + $0x54] ss:$8 sps:$4 sm:$0xff]  }
  0x89   : > { %v2171_v14 = vld [vmem:[%s2677_s20 + $0x50] ss:$8 sps:$4 sm:$0xff]   ;;  %v2172_v15 = vld [vmem:[%s2677_s20 + $0x64] ss:$8 sps:$4 sm:$0xff]   ;;  %v2174_v16 = vld [vmem:[%s2677_s20 + $0x60] ss:$8 sps:$4 sm:$0xff]  }
  0x8a   : > { %v2175_v17 = vld [vmem:[%s2677_s20 + $0x74] ss:$8 sps:$4 sm:$0xff]   ;;  %v2177_v18 = vld [vmem:[%s2677_s20 + $0x70] ss:$8 sps:$4 sm:$0xff]   ;;  %v2712_v19 = vld [vmem:[#allocation2] sm:$0xff]  ;;  %vm2419_vm0 = vmmov 0  }
  0x8b   : > { %603 = vmatpush1.bf16.msra.mxu0 %v2159_v6  ;;  %v2714_v20 = vld [vmem:[#allocation2 + $0x8] sm:$0xff]  ;;  %1940 = vmatprep.mubr.msk.bf16.mxu1 %vm2419_vm0, %v2418_v22  ;;  %s2420_s17 = smov 64   ;;  %vm650_vm1 = vcmask 261120   ;;  %vm774_vm2 = vcmask 1043456   ;;  %v2742_v35 = vld [vmem:[%s2928_s1] sm:$0xff]  ;;  %vm746_vm3 = vcmask 64512  }
  0x8c   : > { %604 = vmatprep.subr.bf16.mxu0 %v2160_v7  ;;  %v503_v21 = vpack.c.bf16 %v2714_v20, %v2712_v19  ;;  %s2421_s29 = smov 32   ;;  %s2422_s25 = smov 96   ;;  %vm1133_vm4 = vcmask 523264  }
  0x8d   : > { %p1870_p11 = scmp.ne.s32.totalorder %s2402_s12, 1 }
  0x8e   : > { %vm2424_vm5 = vmmov (!%p1870_p11), 0   ;;  %vm1517_vm6 = vcmask (!%p1870_p11), 1041409   ;;  %vm1609_vm7 = vcmask (!%p1870_p11), 1041408  }
  0x8f   : > { %605 = vmatpush1.bf16.msra.mxu0 %v2162_v8 }
  0x90   : > { %606 = vmatprep.subr.bf16.mxu0 %v2163_v9 }
  0x93   : > { %607 = vmatpush1.bf16.msra.mxu0 %v2165_v10 }
  0x94   : > { %608 = vmatprep.subr.bf16.mxu0 %v2166_v11 }
  0x97   : > { %609 = vmatpush1.bf16.msra.mxu0 %v2168_v12 }
  0x98   : > { %610 = vmatprep.subr.bf16.mxu0 %v2169_v13 }
  0x9b   : > { %611 = vmatpush1.bf16.msra.mxu0 %v2171_v14 }
  0x9c   : > { %612 = vmatprep.subr.bf16.mxu0 %v2172_v15 }
  0x9f   : > { %613 = vmatpush1.bf16.msra.mxu0 %v2174_v16 }
  0xa0   : > { %614 = vmatprep.subr.bf16.mxu0 %v2175_v17 }
  0xa3   : > { %615 = vmatpush1.bf16.msra.mxu0 %v2177_v18 }
  0xa4   : > { %1974 = vmatprep.subr.bf16.mxu0 %v2418_v22 }
  0xa6   : > { %633 = vmatmul.mubr.bf16.vlgmr.msra.gmra.mrb[0].mxu0 %v503_v21 }
  0xa7   : > { %1976 = vmatprep.mubr.msk.bf16.mxu0 %vm2419_vm0, %v2418_v22 }
 0x179   : > { %v634_v23 = vpop.f32.mrb[0].mxu0 }
 0x17a   : > { %v643_v24 = vpack.c.bf16 %v634_v23, %v634_v23  ;;  %v636_v25 = vpop.f32.mrb[1].mxu0 }
 0x17b   : > { %v638_v26 = vpop.f32.mrb[2].mxu0  ;;  %v2731_v33 = vpack.c.bf16 %v636_v25, %v636_v25 }
 0x17c   : > { %648 = vrot.lane.b32.xlu0 %v643_v24, %s2420_s17  ;;  %v640_v27 = vpop.f32.mrb[3].mxu0  ;;  %v645_v28 = vpack.c.bf16 %v638_v26, %v638_v26 }
 0x17d   : > { %v776_v34 = vsel %vm774_vm2, %v2731_v33, 0  ;;  %v2754_v62 = vpack.c.bf16 %v640_v27, %v640_v27 }
 0x17f   : > { %v822_v1 = vsel %vm774_vm2, %v2754_v62, 0 }
 0x180   : > { %698 = vrot.lane.b32.xlu0 %v645_v28, %s2420_s17 }
 0x1ee   : > { %v649_v29 = vpop.permute.xlu0 %648 }
 0x1ef   : > { %v655_v30 = vsel %vm650_vm1, %v649_v29, 0 }
 0x1f0   : > { %1939 = vmatpush3.bf16.xpose.msra.mxu1 %v655_v30 }
 0x1f1   : > { %1944 = vmatprep.subr.bf16.mxu1 %v2418_v22 }
 0x1f2   : > { %v699_v31 = vpop.permute.xlu0 %698 }
 0x1f3   : > { %v704_v32 = vsel %vm650_vm1, %v699_v31, 0 }
 0x1f7   : > { %1941 = vmatmul.mubr.msk.bf16.vlgmr.msra.gmra.mrb[0].mxu1 %vm650_vm1, %v643_v24 }
 0x1f8   : > { %1945 = vmatpush3.bf16.xpose.msra.mxu1 %v704_v32  ;;  %1946 = vmatprep.mubr.msk.bf16.mxu1 %vm2419_vm0, %v2418_v22 }
 0x1f9   : > { %1950 = vmatprep.subr.bf16.mxu1 %v2418_v22 }
 0x1ff   : > { %1947 = vmatmul.mubr.msk.bf16.vlgmr.msra.gmra.mrb[4].mxu1 %vm650_vm1, %v645_v28 }
 0x200   : > { %1951 = vmatpush3.bf16.msra.mxu1 %v776_v34  ;;  %1952 = vmatprep.mubr.msk.bf16.mxu1 %vm2419_vm0, %v2418_v22 }
 0x201   : > { %1956 = vmatprep.subr.bf16.mxu1 %v2418_v22 }
 0x2ca   : > { %v691_v36 = vpop.f32.mrb[0].mxu1 }
 0x2cb   : > { %v692_v37 = vadd.f32 %v691_v36, %v2742_v35  ;;  %v1942_v38 = vpop.f32.mrb[1].mxu1 }
 0x2cc   : > { %v694_v39 = vpop.f32.mrb[2].mxu1 }
 0x2cd   : > { %v1943_v40 = vpop.f32.mrb[3].mxu1  ;;  %v747_v41 = vsel %vm746_vm3, %v692_v37, -inf }
 0x2ce   : > { %748 = vmax.xlane.f32.xlu1 %v747_v41 }
 0x2d2   : > { %v740_v42 = vpop.f32.mrb[4].mxu1 }
 0x2d3   : > { %v741_v43 = vadd.f32 %v740_v42, %v2742_v35  ;;  %v1948_v44 = vpop.f32.mrb[5].mxu1 }
 0x2d4   : > { %v743_v45 = vpop.f32.mrb[6].mxu1 }
 0x2d5   : > { %v1949_v46 = vpop.f32.mrb[7].mxu1  ;;  %v750_v47 = vsel %vm746_vm3, %v741_v43, -inf }
 0x2d6   : > { %751 = vmax.xlane.f32.xlu1 %v750_v47 }
 0x2e7   : > { %866 = vrot.lane.b32.xlu1 %v643_v24, %s2421_s29 }
 0x35b   : > { %v749_v48 = vpop.xlane.xlu1 %748 }
 0x35c   : > { %v753_v49 = vsub.f32 %v692_v37, %v749_v48 }
 0x35e   : > { %v755_v50 = vmul.f32 1.442695, %v753_v49 }
 0x360   : > { %2198 = vpow2.f32 %v755_v50 }
 0x363   : > { %v752_v51 = vpop.xlane.xlu1 %751 }
 0x364   : > { %v754_v52 = vsub.f32 %v741_v43, %v752_v51 }
 0x366   : > { %v757_v53 = vmul.f32 1.442695, %v754_v52 }
 0x367   : > { %v867_v59 = vpop.permute.xlu1 %866 }
 0x368   : > { %2200 = vpow2.f32 %v757_v53  ;;  %v872_v6 = vsel %vm650_vm1, %v867_v59, 0 }
 0x36a   : > { %v2199_v54 = vpop.eup %2198 }
 0x36b   : > { %v759_v55 = vsel %vm746_vm3, %v2199_v54, 0.0 }
 0x36c   : > { %760 = vadd.xlane.f32.xlu0 %v759_v55  ;;  %v2178_v55 = vld [vmem:[%s2655_s26] sm:$0xff]  }
 0x372   : > { %v2201_v56 = vpop.eup %2200 }
 0x373   : > { %v762_v57 = vsel %vm746_vm3, %v2201_v56, 0.0 }
 0x374   : > { %763 = vadd.xlane.f32.xlu1 %v762_v57  ;;  %v2180_v57 = vld [vmem:[%s2655_s26 + $0x10] sm:$0xff]  }
 0x385   : > { %864 = vrot.lane.b32.xlu1 %v643_v24, %s2422_s25 }
 0x389   : > { %916 = vrot.lane.b32.xlu1 %v645_v28, %s2421_s29 }
 0x38d   : > { %914 = vrot.lane.b32.xlu1 %v645_v28, %s2422_s25 }
 0x3f9   : > { %v761_v58 = vpop.xlane.xlu0 %760 }
 0x3fa   : > { %2202 = vrcp.f32 %v761_v58  ;;  %v2181_v58 = vld [vmem:[%s2655_s26 + $0x18] sm:$0xff]  }
 0x401   : > { %v764_v60 = vpop.xlane.xlu1 %763 }
 0x402   : > { %2204 = vrcp.f32 %v764_v60 }
 0x404   : > { %v2203_v61 = vpop.eup %2202 }
 0x405   : > { %v767_v63 = vmul.f32 %v2203_v61, %v2199_v54  ;;  %v865_v5 = vpop.permute.xlu1 %864 }
 0x407   : > { %v769_v0 = vpack.c.bf16 %v767_v63, %v767_v63 }
 0x409   : > { %1953 = vmatmul.mubr.msk.bf16.vlgmr.msra.gmra.mrb[8].mxu1 %vm746_vm3, %v769_v0  ;;  %v917_v7 = vpop.permute.xlu1 %916 }
 0x40a   : > { %1957 = vmatpush3.bf16.msra.mxu1 %v822_v1  ;;  %1958 = vmatprep.mubr.msk.bf16.mxu1 %vm2419_vm0, %v2418_v22  ;;  %v922_v8 = vsel %vm650_vm1, %v917_v7, 0 }
 0x40b   : > { %1962 = vmatprep.subr.bf16.mxu1 %v2418_v22 }
 0x40c   : > { %v2205_v2 = vpop.eup %2204 }
 0x40d   : > { %v768_v3 = vmul.f32 %v2205_v2, %v2201_v56  ;;  %v915_v9 = vpop.permute.xlu1 %914  ;;  %v2179_v56 = vld [vmem:[%s2655_s26 + $0x8] sm:$0xff]  }
 0x40f   : > { %v770_v4 = vpack.c.bf16 %v768_v3, %v768_v3 }
 0x411   : > { %1959 = vmatmul.mubr.msk.bf16.vlgmr.msra.gmra.mrb[12].mxu1 %vm746_vm3, %v770_v4 }
 0x412   : > { %1964 = vmatprep.mubr.msk.bf16.mxu1 %vm2419_vm0, %v2418_v22 }
 0x413   : > { %1963 = vmatpush3.bf16.xpose.msra.mxu1 %v872_v6 }
 0x414   : > { %1968 = vmatprep.subr.bf16.mxu1 %v2418_v22 }
 0x41a   : > { %1965 = vmatmul.mubr.msk.bf16.vlgmr.msra.gmra.mrb[16].mxu1 %vm650_vm1, %v865_v5 }
 0x41b   : > { %1969 = vmatpush3.bf16.xpose.msra.mxu1 %v922_v8  ;;  %1970 = vmatprep.mubr.msk.bf16.mxu1 %vm2419_vm0, %v2418_v22 }
 0x41c   : > { %1980 = vmatprep.subr.bf16.mxu1 %v2418_v22 }
 0x422   : > { %1971 = vmatmul.mubr.msk.bf16.vlgmr.msra.gmra.mrb[20].mxu1 %vm650_vm1, %v915_v9 }
 0x423   : > { %1982 = vmatprep.mubr.msk.bf16.mxu1 %vm2419_vm0, %v2418_v22 }
 0x4dc   : > { %v2775_v10 = vpop.f32.mrb[8].mxu1 }
 0x4dd   : > { %v1954_v11 = vpop.f32.mrb[9].mxu1 }
 0x4de   : > { %v815_v12 = vpop.f32.mrb[10].mxu1  ;;  %v1105_v11 = vlaneseq }
 0x4df   : > { %v1955_v13 = vpop.f32.mrb[11].mxu1 }
 0x4e0   : > { %v2814_v12 = vshrl.u32 %v1105_v11, 7 }
 0x4e2   : > { %v1107_v13 = vsub.s32 0, %v2814_v12 }
 0x4e4   : > { %v2777_v14 = vpop.f32.mrb[12].mxu1 }
 0x4e5   : > { %v1960_v15 = vpop.f32.mrb[13].mxu1 }
 0x4e6   : > { %v861_v16 = vpop.f32.mrb[14].mxu1  ;;  %v2818_v15 = vld [vmem:[%s2682_s28] sm:$0xff] }
 0x4e7   : > { %v1961_v17 = vpop.f32.mrb[15].mxu1  ;;  %v1108_v16 = vrot.slane %v2818_v15, %v1107_v13 }
 0x4ed   : > { %v908_v18 = vpop.f32.mrb[16].mxu1 }
 0x4ee   : > { %v909_v21 = vadd.f32 %v908_v18, %v2742_v35  ;;  %v1966_v23 = vpop.f32.mrb[17].mxu1 }
 0x4ef   : > { %v911_v24 = vpop.f32.mrb[18].mxu1 }
 0x4f0   : > { %v1967_v25 = vpop.f32.mrb[19].mxu1  ;;  %v964_v26 = vsel %vm746_vm3, %v909_v21, -inf }
 0x4f1   : > { %965 = vmax.xlane.f32.xlu0 %v964_v26  ;;  %v2182_v26 = vld [vmem:[%s2687_s27] sm:$0xff]  }
 0x4f5   : > { %v958_v27 = vpop.f32.mrb[20].mxu1 }
 0x4f6   : > { %v959_v28 = vadd.f32 %v958_v27, %v2742_v35  ;;  %v1972_v29 = vpop.f32.mrb[21].mxu1  ;;  %v1190_v27 = vsub.s32 7, %v2814_v12 }
 0x4f7   : > { %v961_v30 = vpop.f32.mrb[22].mxu1 }
 0x4f8   : > { %v1973_v31 = vpop.f32.mrb[23].mxu1  ;;  %v967_v32 = vsel %vm746_vm3, %v959_v28, -inf  ;;  %v2833_v30 = vrot.slane %v2818_v15, %v1190_v27 }
 0x4f9   : > { %968 = vmax.xlane.f32.xlu1 %v967_v32 }
 0x507   : > { %989 = vrot.lane.b32.xlu0 %v2731_v33, %s2422_s25 }
 0x57e   : > { %v966_v34 = vpop.xlane.xlu0 %965 }
 0x57f   : > { %v970_v36 = vsub.f32 %v909_v21, %v966_v34 }
 0x581   : > { %v972_v37 = vmul.f32 1.442695, %v970_v36 }
 0x582   : > { %v990_v38 = vpop.permute.xlu0 %989 }
 0x583   : > { %2206 = vpow2.f32 %v972_v37  ;;  %v995_v39 = vsel %vm774_vm2, %v990_v38, 0 }
 0x584   : > { %1975 = vmatpush3.bf16.msra.mxu0 %v995_v39  ;;  %v2183_v39 = vld [vmem:[%s2687_s27 + $0x8] sm:$0xff]  }
 0x585   : > { %1986 = vmatprep.subr.bf16.mxu0 %v2418_v22 }
 0x586   : > { %v969_v35 = vpop.xlane.xlu1 %968 }
 0x587   : > { %v971_v40 = vsub.f32 %v959_v28, %v969_v35  ;;  %v2184_v35 = vld [vmem:[%s2687_s27 + $0x10] sm:$0xff]  }
 0x589   : > { %v974_v41 = vmul.f32 1.442695, %v971_v40  ;;  %v2185_v40 = vld [vmem:[%s2687_s27 + $0x18] sm:$0xff]  }
 0x58b   : > { %2208 = vpow2.f32 %v974_v41  ;;  %v2186_v41 = vld [vmem:[%s2687_s27 + $0x20] sm:$0xff]  }
 0x58d   : > { %v2207_v42 = vpop.eup %2206 }
 0x58e   : > { %v976_v43 = vsel %vm746_vm3, %v2207_v42, 0.0 }
 0x58f   : > { %977 = vadd.xlane.f32.xlu0 %v976_v43  ;;  %v2188_v43 = vld [vmem:[%s2687_s27 + $0x30] sm:$0xff]  }
 0x595   : > { %v2209_v44 = vpop.eup %2208 }
 0x596   : > { %v979_v33 = vsel %vm746_vm3, %v2209_v44, 0.0 }
 0x597   : > { %980 = vadd.xlane.f32.xlu0 %v979_v33  ;;  %v2190_v33 = vld [vmem:[%s2662_s21] sm:$0xff]  }
 0x5ad   : > { %1038 = vrot.lane.b32.xlu0 %v2754_v62, %s2422_s25 }
 0x61c   : > { %v978_v45 = vpop.xlane.xlu0 %977 }
 0x61d   : > { %2210 = vrcp.f32 %v978_v45  ;;  %v2191_v45 = vld [vmem:[%s2662_s21 + $0x8] sm:$0xff]  }
 0x624   : > { %v981_v46 = vpop.xlane.xlu0 %980 }
 0x625   : > { %2212 = vrcp.f32 %v981_v46  ;;  %v2192_v46 = vld [vmem:[%s2662_s21 + $0x10] sm:$0xff]  }
 0x627   : > { %v2211_v47 = vpop.eup %2210 }
 0x628   : > { %v984_v48 = vmul.f32 %v2211_v47, %v2207_v42  ;;  %v1039_v49 = vpop.permute.xlu0 %1038  ;;  %v2187_v42 = vld [vmem:[%s2687_s27 + $0x28] sm:$0xff]  }
 0x629   : > { %v1044_v50 = vsel %vm774_vm2, %v1039_v49, 0  ;;  %v2193_v47 = vld [vmem:[%s2662_s21 + $0x18] sm:$0xff]   ;;  %v2195_v49 = vld [vmem:[%s2662_s21 + $0x28] sm:$0xff]  }
 0x62a   : > { %1981 = vmatpush3.bf16.msra.mxu1 %v1044_v50  ;;  %v986_v51 = vpack.c.bf16 %v984_v48, %v984_v48  ;;  %v2194_v48 = vld [vmem:[%s2662_s21 + $0x20] sm:$0xff]  }
 0x62b   : > { %1998 = vmatprep.subr.bf16.mxu1 %v2418_v22 }
 0x62c   : > { %1977 = vmatmul.mubr.msk.bf16.vlgmr.msra.gmra.mrb[4].mxu0 %vm746_vm3, %v986_v51 }
 0x62d   : > { %1994 = vmatprep.mubr.msk.bf16.mxu0 %vm2419_vm0, %v2418_v22  ;;  %1987 = vmatpush3.bf16.msra.mxu0 %v2178_v55 }
 0x62e   : > { %1988 = vmatprep.subr.bf16.mxu0 %v2418_v22 }
 0x62f   : > { %v2213_v52 = vpop.eup %2212 }
 0x630   : > { %v985_v53 = vmul.f32 %v2213_v52, %v2209_v44  ;;  %v2189_v44 = vld [vmem:[%s2687_s27 + $0x38] sm:$0xff]  }
 0x631   : > { %1989 = vmatpush3.bf16.msra.mxu0 %v2179_v56  ;;  %v1210_v56 = vsub.s32 1, %v2814_v12 }
 0x632   : > { %v987_v54 = vpack.c.bf16 %v985_v53, %v985_v53  ;;  %1990 = vmatprep.subr.bf16.mxu0 %v2418_v22 }
 0x634   : > { %1983 = vmatmul.mubr.msk.bf16.vlgmr.msra.gmra.mrb[24].mxu1 %vm746_vm3, %v987_v54 }
 0x635   : > { %2014 = vmatprep.mubr.msk.bf16.mxu1 %vm2419_vm0, %v2418_v22  ;;  %1991 = vmatpush3.bf16.msra.mxu0 %v2180_v57 }
 0x636   : > { %1992 = vmatprep.subr.bf16.mxu0 %v2418_v22  ;;  %1999 = vmatpush3.bf16.msra.mxu1 %v2182_v26 }
 0x637   : > { %2000 = vmatprep.subr.bf16.mxu1 %v2418_v22 }
 0x639   : > { %1993 = vmatpush3.bf16.msra.mxu0 %v2181_v58 }
 0x63a   : > { %2018 = vmatprep.subr.bf16.mxu0 %v2418_v22  ;;  %2001 = vmatpush3.bf16.msra.mxu1 %v2183_v39 }
 0x63b   : > { %2002 = vmatprep.subr.bf16.mxu1 %v2418_v22 }
 0x63e   : > { %2003 = vmatpush3.bf16.msra.mxu1 %v2184_v35 }
 0x63f   : > { %2004 = vmatprep.subr.bf16.mxu1 %v2418_v22 }
 0x642   : > { %2005 = vmatpush3.bf16.msra.mxu1 %v2185_v40 }
 0x643   : > { %2006 = vmatprep.subr.bf16.mxu1 %v2418_v22 }
 0x646   : > { %2007 = vmatpush3.bf16.msra.mxu1 %v2186_v41 }
 0x647   : > { %2008 = vmatprep.subr.bf16.mxu1 %v2418_v22 }
 0x64a   : > { %2009 = vmatpush3.bf16.msra.mxu1 %v2187_v42 }
 0x64b   : > { %2010 = vmatprep.subr.bf16.mxu1 %v2418_v22 }
 0x64e   : > { %2011 = vmatpush3.bf16.msra.mxu1 %v2188_v43 }
 0x64f   : > { %2012 = vmatprep.subr.bf16.mxu1 %v2418_v22 }
 0x652   : > { %2013 = vmatpush3.bf16.msra.mxu1 %v2189_v44 }
 0x6ff   : > { %v1031_v59 = vpop.f32.mrb[4].mxu0 }
 0x700   : > { %v1978_v60 = vpop.f32.mrb[5].mxu0 }
 0x701   : > { %v1034_v61 = vpop.f32.mrb[6].mxu0  ;;  %v1216_v60 = vsub.s32 2, %v2814_v12 }
 0x702   : > { %v1979_v62 = vpop.f32.mrb[7].mxu0 }
 0x707   : > { %v1080_v63 = vpop.f32.mrb[24].mxu1 }
 0x708   : > { %v2149_v0 = vpack.i.bf16 %v1080_v63, %v1031_v59  ;;  %v1984_v1 = vpop.f32.mrb[25].mxu1  ;;  %v1211_v59 = vrot.slane %v2818_v15, %v1210_v56 }
 0x709   : > { %v1083_v2 = vpop.f32.mrb[26].mxu1 }
 0x70a   : > { %2150 = vrot.lane.b32.xlu0 %v2149_v0, %s2421_s29  ;;  %v1985_v3 = vpop.f32.mrb[27].mxu1  ;;  %v1217_v0 = vrot.slane %v2818_v15, %v1216_v60  ;;  %v2223_v60 = vld [vmem:[#allocation8 + $0x8] sm:$0xff] (!%p1870_p11)  }
 0x77c   : > { %v2151_v4 = vpop.permute.xlu0 %2150 }
 0x77d   : > { %v2153_v5 = vunpack.i.h.bf16 %v2151_v4  ;;  %v2152_v6 = vunpack.i.l.bf16 %v2151_v4 }
 0x77f   : > { %v1095_v7 = vsel %vm650_vm1, %v2777_v14, %v2153_v5  ;;  %v1094_v8 = vsel %vm650_vm1, %v2775_v10, %v2152_v6  ;;  %v2196_v5 = vld [vmem:[%s2662_s21 + $0x30] sm:$0xff]   ;;  %v2197_v6 = vld [vmem:[%s2662_s21 + $0x38] sm:$0xff]  }
 0x780   : > { %v1096_v9 = vpack.c.bf16 %v1095_v7, %v1094_v8  ;;  %v1239_v7 = vsub.s32 3, %v2814_v12 }
 0x782   : > { %1995 = vmatmul.mubr.msk.bf16.vlgmr.msra.gmra.mrb[8].mxu0 %vm1133_vm4, %v1096_v9  ;;  %v1240_v8 = vrot.slane %v2818_v15, %v1239_v7  ;;  %v2229_v7 = vld [vmem:[#allocation8 + $0x38] sm:$0xff] (!%p1870_p11)  }
 0x783   : > { %2034 = vmatprep.mubr.msk.bf16.mxu0 %vm2419_vm0, %v2418_v22  ;;  %2019 = vmatpush3.bf16.msra.mxu0 %v2190_v33 }
 0x784   : > { %2020 = vmatprep.subr.bf16.mxu0 %v2418_v22 }
 0x787   : > { %2021 = vmatpush3.bf16.msra.mxu0 %v2191_v45 }
 0x788   : > { %2022 = vmatprep.subr.bf16.mxu0 %v2418_v22 }
 0x78b   : > { %2023 = vmatpush3.bf16.msra.mxu0 %v2192_v46 }
 0x78c   : > { %2024 = vmatprep.subr.bf16.mxu0 %v2418_v22 }
 0x78f   : > { %2025 = vmatpush3.bf16.msra.mxu0 %v2193_v47  ;;  %v1470_v47 = vsub.s32 5, %v2814_v12 }
 0x790   : > { %2026 = vmatprep.subr.bf16.mxu0 %v2418_v22 }
 0x793   : > { %2027 = vmatpush3.bf16.msra.mxu0 %v2194_v48  ;;  %v1476_v48 = vsub.s32 6, %v2814_v12 }
 0x794   : > { %2028 = vmatprep.subr.bf16.mxu0 %v2418_v22 }
 0x797   : > { %2029 = vmatpush3.bf16.msra.mxu0 %v2195_v49  ;;  %v1471_v49 = vrot.slane %v2818_v15, %v1470_v47 }
 0x798   : > { %2030 = vmatprep.subr.bf16.mxu0 %v2418_v22 }
 0x79b   : > { %2031 = vmatpush3.bf16.msra.mxu0 %v2196_v5 }
 0x79c   : > { %2032 = vmatprep.subr.bf16.mxu0 %v2418_v22 }
 0x79f   : > { %2033 = vmatpush3.bf16.msra.mxu0 %v2197_v6 }
 0x855   : > { %v1171_v14 = vpop.f32.mrb[8].mxu0 }
 0x856   : > { %v2821_v17 = vadd.f32 %v1171_v14, %v1108_v16  ;;  %v1996_v10 = vpop.f32.mrb[9].mxu0 }
 0x857   : > { %v1174_v18 = vpop.f32.mrb[10].mxu0 }
 0x858   : > { %v2823_v21 = vadd.f32 %v1174_v18, %v1108_v16  ;;  %v1997_v23 = vpop.f32.mrb[11].mxu0  ;;  %v1178_v24 = vadd.f32 %v2821_v17, %v2712_v19 }
 0x85a   : > { %1180 = vadd.xlane.f32.xlu1 %v1178_v24  ;;  %v1179_v25 = vadd.f32 %v2823_v21, %v2714_v20 }
 0x85c   : > { %1182 = vadd.xlane.f32.xlu0 %v1179_v25 }
 0x8e7   : > { %v1181_v28 = vpop.xlane.xlu1 %1180 }
 0x8e8   : > { %v1184_v29 = vmul.f32 0.03125, %v1181_v28 }
 0x8e9   : > { %v1183_v31 = vpop.xlane.xlu0 %1182 }
 0x8ea   : > { %v1186_v19 = vsub.f32 %v1178_v24, %v1184_v29  ;;  %v1185_v32 = vmul.f32 0.03125, %v1183_v31 }
 0x8ec   : > { %v1187_v34 = vsub.f32 %v1179_v25, %v1185_v32  ;;  %v1192_v20 = vmul.f32 %v2833_v30, %v1186_v19  ;;  %v1351_v25 = vsub.s32 4, %v2814_v12 }
 0x8ee   : > { %v1194_v36 = vmul.f32 %v1192_v20, %v1192_v20  ;;  %v1193_v37 = vmul.f32 %v2833_v30, %v1187_v34  ;;  %v1352_v22 = vrot.slane %v2818_v15, %v1351_v25 }
 0x8f0   : > { %1196 = vadd.xlane.f32.xlu1 %v1194_v36  ;;  %v1195_v38 = vmul.f32 %v1193_v37, %v1193_v37 }
 0x8f4   : > { %1198 = vadd.xlane.f32.xlu1 %v1195_v38 }
 0x97d   : > { %v1197_v50 = vpop.xlane.xlu1 %1196 }
 0x97e   : > { %v1200_v51 = vmul.f32 0.03125, %v1197_v50 }
 0x980   : > { %v1202_v52 = vadd.f32 1e-05, %v1200_v51  ;;  %v1477_v51 = vrot.slane %v2818_v15, %v1476_v48  ;;  %v2224_v15 = vld [vmem:[#allocation8 + $0x10] sm:$0xff] (!%p1870_p11)  }
 0x981   : > { %v1199_v53 = vpop.xlane.xlu1 %1198 }
 0x982   : > { %2214 = vrsqrt.f32 %v1202_v52  ;;  %v1201_v54 = vmul.f32 0.03125, %v1199_v53 }
 0x984   : > { %v1203_v55 = vadd.f32 1e-05, %v1201_v54 }
 0x986   : > { %2216 = vrsqrt.f32 %v1203_v55 }
 0x98c   : > { %v2215_v57 = vpop.eup %2214 }
 0x98d   : > { %v1206_v58 = vmul.f32 %v2215_v57, %v1192_v20 }
 0x98f   : > { %v1212_v63 = vmul.f32 %v1211_v59, %v1206_v58  ;;  %v2222_v58 = vld [vmem:[#allocation8] sm:$0xff] (!%p1870_p11)  }
 0x990   : > { %v2217_v61 = vpop.eup %2216 }
 0x991   : > { %v1207_v62 = vmul.f32 %v2217_v61, %v1193_v37  ;;  %v1218_v2 = vadd.f32 %v1217_v0, %v1212_v63  ;;  %v2225_v61 = vld [vmem:[#allocation8 + $0x18] sm:$0xff] (!%p1870_p11)  }
 0x993   : > { %v1213_v1 = vmul.f32 %v1211_v59, %v1207_v62  ;;  %v2423_v59 = vmov (!%p1870_p11), 0.0   ;;  %v2226_v62 = vld [vmem:[#allocation8 + $0x20] sm:$0xff] (!%p1870_p11)  }
 0x994   : > { %2038 = vmatprep.subr.bf16.mxu0 (!%p1870_p11), %v2423_v59 }
 0x995   : > { %v1219_v3 = vadd.f32 %v1217_v0, %v1213_v1  ;;  %v2227_v1 = vld [vmem:[#allocation8 + $0x28] sm:$0xff] (!%p1870_p11)  }
 0x997   : > { %v1220_v4 = vpack.c.bf16 %v1219_v3, %v1218_v2 }
 0x999   : > { %2015 = vmatmul.mubr.bf16.vlgmr.msra.gmra.mrb[28].mxu1 %v1220_v4  ;;  %v2228_v4 = vld [vmem:[#allocation8 + $0x30] sm:$0xff] (!%p1870_p11)  }
 0xa6c   : > { %v1323_v9 = vpop.f32.mrb[28].mxu1 }
 0xa6d   : > { %v1324_v11 = vadd.f32 %v1323_v9, %v1240_v8  ;;  %v2016_v13 = vpop.f32.mrb[29].mxu1 }
 0xa6e   : > { %v1326_v16 = vpop.f32.mrb[30].mxu1 }
 0xa6f   : > { %v1327_v14 = vadd.f32 %v1326_v16, %v1240_v8  ;;  %v2017_v10 = vpop.f32.mrb[31].mxu1  ;;  %v1330_v18 = vmax.f32 %v1324_v11, 0.0  ;;  %v1871_v11 = vld [vmem:[%s2935_s8] ss:$0 sm:$0xff] (!%p1870_p11) }
 0xa71   : > { %v1331_v23 = vmax.f32 %v1327_v14, 0.0 }
 0xa73   : > { %v1332_v24 = vpack.c.bf16 %v1331_v23, %v1330_v18 }
 0xa75   : > { %2035 = vmatmul.mubr.bf16.vlgmr.msra.gmra.mrb[12].mxu0 %v1332_v24 }
 0xa76   : > { %2039 = vmatpush3.bf16.msra.mxu0 (!%p1870_p11), %v2222_v58  ;;  %2054 = vmatprep.mubr.msk.bf16.mxu0 (!%p1870_p11), %vm2424_vm5, %v2423_v59 }
 0xa77   : > { %2040 = vmatprep.subr.bf16.mxu0 (!%p1870_p11), %v2423_v59 }
 0xa7a   : > { %2041 = vmatpush3.bf16.msra.mxu0 (!%p1870_p11), %v2223_v60 }
 0xa7b   : > { %2042 = vmatprep.subr.bf16.mxu0 (!%p1870_p11), %v2423_v59 }
 0xa7e   : > { %2043 = vmatpush3.bf16.msra.mxu0 (!%p1870_p11), %v2224_v15 }
 0xa7f   : > { %2044 = vmatprep.subr.bf16.mxu0 (!%p1870_p11), %v2423_v59 }
 0xa82   : > { %2045 = vmatpush3.bf16.msra.mxu0 (!%p1870_p11), %v2225_v61 }
 0xa83   : > { %2046 = vmatprep.subr.bf16.mxu0 (!%p1870_p11), %v2423_v59 }
 0xa86   : > { %2047 = vmatpush3.bf16.msra.mxu0 (!%p1870_p11), %v2226_v62 }
 0xa87   : > { %2048 = vmatprep.subr.bf16.mxu0 (!%p1870_p11), %v2423_v59 }
 0xa8a   : > { %2049 = vmatpush3.bf16.msra.mxu0 (!%p1870_p11), %v2227_v1 }
 0xa8b   : > { %2050 = vmatprep.subr.bf16.mxu0 (!%p1870_p11), %v2423_v59 }
 0xa8e   : > { %2051 = vmatpush3.bf16.msra.mxu0 (!%p1870_p11), %v2228_v4 }
 0xa8f   : > { %2052 = vmatprep.subr.bf16.mxu0 (!%p1870_p11), %v2423_v59 }
 0xa92   : > { %2053 = vmatpush3.bf16.msra.mxu0 (!%p1870_p11), %v2229_v7 }
 0xb48   : > { %v1435_v26 = vpop.f32.mrb[12].mxu0 }
 0xb49   : > { %v1436_v27 = vadd.f32 %v1435_v26, %v1352_v22  ;;  %v2036_v28 = vpop.f32.mrb[13].mxu0 }
 0xb4a   : > { %v1438_v29 = vpop.f32.mrb[14].mxu0 }
 0xb4b   : > { %v1439_v31 = vadd.f32 %v1438_v29, %v1352_v22  ;;  %v2037_v19 = vpop.f32.mrb[15].mxu0  ;;  %v1442_v32 = vadd.f32 %v1436_v27, %v2821_v17  ;;  %v2425_v29 = vmov (!%p1870_p11), 1966171168  }
 0xb4d   : > { %1444 = vadd.xlane.f32.xlu1 %v1442_v32  ;;  %v1443_v34 = vadd.f32 %v1439_v31, %v2823_v21  ;;  %v1623_v31 = vunpack.c.l.s4 (!%p1870_p11), %v2425_v29 }
 0xb4f   : > { %v1624_v19 = vunpack.c.0.s8 (!%p1870_p11), %v1623_v31 }
 0xb51   : > { %1446 = vadd.xlane.f32.xlu1 %v1443_v34 }
 0xbda   : > { %v1445_v20 = vpop.xlane.xlu1 %1444 }
 0xbdb   : > { %v1448_v36 = vmul.f32 0.03125, %v1445_v20 }
 0xbdd   : > { %v1450_v37 = vsub.f32 %v1442_v32, %v1448_v36  ;;  %v1627_v32 = vsub.s32 (!%p1870_p11), %v1624_v19, %v2814_v12 }
 0xbde   : > { %v1447_v38 = vpop.xlane.xlu1 %1446 }
 0xbdf   : > { %v1449_v39 = vmul.f32 0.03125, %v1447_v38  ;;  %v1452_v35 = vmul.f32 %v1450_v37, %v2833_v30 }
 0xbe1   : > { %v1451_v40 = vsub.f32 %v1443_v34, %v1449_v39  ;;  %v1454_v41 = vmul.f32 %v1452_v35, %v1452_v35 }
 0xbe3   : > { %1456 = vadd.xlane.f32.xlu1 %v1454_v41  ;;  %v1453_v42 = vmul.f32 %v1451_v40, %v2833_v30 }
 0xbe5   : > { %v1455_v43 = vmul.f32 %v1453_v42, %v1453_v42 }
 0xbe7   : > { %1458 = vadd.xlane.f32.xlu1 %v1455_v43 }
 0xc70   : > { %v1457_v44 = vpop.xlane.xlu1 %1456 }
 0xc71   : > { %v1460_v17 = vmul.f32 0.03125, %v1457_v44 }
 0xc73   : > { %v1462_v33 = vadd.f32 1e-05, %v1460_v17 }
 0xc74   : > { %v1459_v45 = vpop.xlane.xlu1 %1458 }
 0xc75   : > { %2218 = vrsqrt.f32 %v1462_v33  ;;  %v1461_v21 = vmul.f32 0.03125, %v1459_v45 }
 0xc77   : > { %v1463_v46 = vadd.f32 1e-05, %v1461_v21 }
 0xc79   : > { %2220 = vrsqrt.f32 %v1463_v46 }
 0xc7f   : > { %v2219_v50 = vpop.eup %2218 }
 0xc80   : > { %v1466_v30 = vmul.f32 %v2219_v50, %v1452_v35 }
 0xc82   : > { %v1472_v52 = vmul.f32 %v1471_v49, %v1466_v30 }
 0xc83   : > { %v2221_v53 = vpop.eup %2220 }
 0xc84   : > { %v1478_v54 = vadd.f32 %v1477_v51, %v1472_v52  ;;  %v1467_v55 = vmul.f32 %v2221_v53, %v1453_v42  ;;  %1485 = sbr.rel (%p1870_p11) target bundleno = 3752 (0xea8), region = 76 }
 0xc86   : > { %1480 = vst [vmem:[#allocation2] sm:$0xff] %v1478_v54  ;;  %v1473_v56 = vmul.f32 %v1471_v49, %v1467_v55  ;;  %v1486_v63 = vpack.c.bf16 (!%p1870_p11), %v1478_v54, %v1478_v54 }
 0xc88   : > { %v1479_v57 = vadd.f32 %v1477_v51, %v1473_v56  ;;  %v1513_v2 = vunpack.c.l.b16 (!%p1870_p11), %v1486_v63 }
 0xc8a   : > { %1481 = vst [vmem:[#allocation2 + $0x8] sm:$0xff] %v1479_v57  ;;  %v1487_v0 = vpack.c.bf16 (!%p1870_p11), %v1479_v57, %v1479_v57  ;;  %v1515_v5 = vrot.slane (!%p1870_p11), %v1513_v2, 7 }
 0xc8c   : > { %v1514_v3 = vunpack.c.l.b16 %v1487_v0 }
 0xc8e   : > { %v1516_v6 = vrot.slane %v1514_v3, 6 }
 0xc90   : > { %v1518_v8 = vsel %vm1517_vm6, %v1516_v6, %v1515_v5 }
 0xc91   : > { %v1519_v9 = vpack.c.b16 %v1518_v8, %v1518_v8 }
 0xc93   : > { %2055 = vmatmul.mubr.bf16.vlgmr.msra.gmra.mrb[0].mxu0 %v1519_v9 }
 0xd66   : > { %v1603_v13 = vpop.f32.mrb[0].mxu0 }
 0xd67   : > { %v1604_v16 = vadd.f32 %v1871_v11, %v1603_v13  ;;  %v2056_v14 = vpop.f32.mrb[1].mxu0 }
 0xd68   : > { %v1606_v10 = vpop.f32.mrb[2].mxu0 }
 0xd69   : > { %v2057_v18 = vpop.f32.mrb[3].mxu0  ;;  %v1610_v23 = vsel %vm1609_vm7, %v1604_v16, -inf }
 0xd6a   : > { %1611 = vmax.xlane.f32.xlu0 %v1610_v23 }
 0xdf7   : > { %v1612_v24 = vpop.xlane.xlu0 %1611 }
 0xdf8   : > { %v1613_v25 = vsub.f32 %v1604_v16, %v1612_v24 }
 0xdfa   : > { %v1614_v22 = vmul.f32 1.442695, %v1613_v25 }
 0xdfc   : > { %2230 = vpow2.f32 %v1614_v22 }
 0xe06   : > { %v2231_v26 = vpop.eup %2230 }
 0xe07   : > { %v1616_v27 = vsel %vm1609_vm7, %v2231_v26, 0.0 }
 0xe08   : > { %1617 = vadd.xlane.f32.xlu0 %v1616_v27 }
 0xe95   : > { %v1618_v28 = vpop.xlane.xlu0 %1617 }
 0xe96   : > { %2232 = vrcp.f32 %v1618_v28 }
 0xea0   : > { %v2233_v34 = vpop.eup %2232 }
 0xea1   : > { %v1620_v20 = vmul.f32 %v2233_v34, %v2231_v26 }
 0xea3   : > { %v1628_v36 = vrot.slane %v1620_v20, %v1627_v32 }
 0xea5   : > { %v1629_v37 = vcombine.high %v1628_v36, %v1628_v36  ;;  %1880 = vst.sshfl [vmem:[#allocation9] sm:$0x1 pattern:$0x73625140] %v1628_v36 }
 0xea7   : > { %1881 = vst.sshfl [vmem:[#allocation9 + $0x1] sm:$0x1 pattern:$0x73625140] %v1629_v37 }
 0xea8 PF: > { %p2084_p13 = scmp.eq.s32.totalorder %s2508_s15, 1  ;;  %s2426_s21 = smov [#allocation9]  }
 0xea9   : > { %s1657_s20 = sshll.u32 %s2426_s21, 4  ;;  %s1658_s20 = int_to_ptr.vmem [resolvable:$true] %s1657_s20 }
 0xeaa   : > { %s2322_s3 = scalar_lea.vmem %s1658_s20, 32  ;;  %p2329_p6 = scmp.lt.s32.totalorder %s1658_s20, %s1658_s20 }
 0xeab   : > { %p2323_p2 = scmp.ne.s32.totalorder %s1658_s20, %s2322_s3  ;;  %p2330_p4 = scmp.lt.s32.totalorder %s2322_s3, %s2322_s3 }
 0xead   : > { %p2324_p3 = pnand %p2323_p2, %p2084_p13  ;;  %p2331_p5 = por %p2330_p4, %p2329_p6 }
 0xeaf   : > { %p2325_p0 = pneg %p2324_p3 }
 0xeb1   : > { %p2332_p12 = pnand %p2331_p5, %p2325_p0 }
 0xeb3   : > { %2335 = shalt.err (!%p2332_p12)
}
 0xeb4   : > { %s2966_s23 = sld [smem:[#allocation19_spill]] }
 0xeba   : > { %s2336_s24 = scalar_lea.hbm %s2966_s23, 32 }
 0xebb   : > { %p2337_p1 = scmp.ne.s32.totalorder %s2966_s23, %s2336_s24  ;;  %p2342_p9 = scmp.lt.u32.totalorder %s2336_s24, %s2966_s23 }
 0xebd   : > { %p2338_p7 = pnand %p2337_p1, %p2084_p13 }
 0xebf   : > { %p2339_p8 = pneg %p2338_p7 }
 0xec1   : > { %p2344_p10 = pnand %p2342_p9, %p2339_p8 }
 0xec3   : > { %2347 = shalt.err (!%p2344_p10)
}
 0xec4   : > { %s2427_s22 = smov 16   ;;  %s2428_s11 = smov 1  }
 0xec5   : > { %2067 = dma.vmem_to_hbm [thread:$0]  (%p2084_p13), %s1658_s20, 32, %s2966_s23, [#allocation5], %s2427_s22, %s2427_s22, %s2428_s11  }
 0xec6   : > { %2385 = dma.done.wait (%p2084_p13), [#allocation5], 32  }
 0xec7   : > { %2387 = vsyncadd (%p2084_p13), [#allocation5], 4294967264 }
 0xec8 PF: > { %s26_s14 = sadd.s32 1, %s2410_s14   ;;  %s2967_s19 = sld [smem:[#allocation14_spill]] }
 0xec9   : > { %p23_p11 = scmp.ge.s32.totalorder %s26_s14, 4   ;;  %s2968_s11 = sld [smem:[#allocation16_spill]] }
 0xeca   : > { %s2969_s29 = sld [smem:[#allocation15_spill]]  ;;  %s2970_s30 = smov %s2394_s10 }
 0xecb   : > { %s2972_s12 = smov %s2406_s13  ;;  %25 = sbr.rel (!%p23_p11) target bundleno = 11 (0xb), region = 131 }
 0xece   : > { %s2971_s10 = smov %s2967_s19 }
 0xed0   : > { %s2973_s13 = smov %s2969_s29 }
 0xed2   :  { %1673 = vsyncpa [#allocation4], 1 }
 0xed3   :  { %1675 = vsyncpa [#allocation4 + $0x1], 1 }
 0xed4   :  { %1676 = vsyncpa [#allocation7], 1 }
 0xed5   :  { %1678 = vsyncpa [#allocation7 + $0x1], 1 }
 0xed6   :  { %1679 = vsyncpa [#allocation5], 1 }
 0xed7   :  { %1681 = vsyncpa [#allocation5 + $0x1], 1 }

</bundles_post_ra>
